<compile_context>
chip_gen: v7x
topology: tpu7x:2x2x1
jax: 0.10.0
libtpu: 0.0.40
codegen_flags: <defaults>
</compile_context>

<pallas_src>
import functools
import math

import jax
import jax.numpy as jnp
from jax import lax
from jax.experimental import pallas as pl
from jax.experimental.pallas import tpu as pltpu


# ---------------------------------------------------------------------------
# helpers
# ---------------------------------------------------------------------------

def _pick_nb(n, bytes_per_n, target_bytes=2 << 20, min_parallel_steps=4):
    """How many batch elements to process per grid step.

    Big blocks amortize the ~0.35us per-grid-step overhead (mem-bound kernel),
    but we keep >= min_parallel_steps grid steps whenever N allows so both
    v7x TensorCores stay busy and the pipeline can prefetch step i+1."""
    if n <= min_parallel_steps:
        return 1
    nb = max(1, min(n // min_parallel_steps, target_bytes // max(1, bytes_per_n)))
    while n % nb:
        nb -= 1
    return nb


def _mosaic_params(block_bytes):
    # Explicit VMEM budget: double-buffered blocks + generous margin (feedback:
    # make the budget explicit so larger Nb/HW blocks fail loudly, not silently).
    vmem = max(4 << 20, int(2 * block_bytes) + (1 << 20))
    return pltpu.CompilerParams(
        dimension_semantics=("parallel",),
        vmem_limit_bytes=min(vmem, 48 << 20),   # conservative vs v7x 64 MiB VMEM
    )


def _fold_bn(gamma, beta, mean, var, eps):
    """Eval-mode BatchNorm folded into per-channel scale/shift."""
    scale = gamma / jnp.sqrt(var + eps)
    shift = beta - mean * scale
    return scale, shift


def _im2col(x_nchw, k, pad):
    """(N, C, H, W) -> (N, C*k*k, H*W) patches; column order (dy, dx, ci)."""
    # TODO(synk): fold patch extraction into a direct in-kernel shifted-matmul
    # conv to avoid the k*k x HBM blow-up of materialized patches.
    n, c, h, w = x_nchw.shape
    xp = jnp.pad(x_nchw, ((0, 0), (0, 0), (pad, pad), (pad, pad)))
    cols = [xp[:, :, dy:dy + h, dx:dx + w] for dy in range(k) for dx in range(k)]
    return jnp.concatenate(cols, axis=1).reshape(n, c * k * k, h * w)


def _conv_weight_as_matrix(w):
    """(Cout, Cin, k, k) -> (Cout, k*k*Cin) matching _im2col column order."""
    cout, cin, kh, kw = w.shape
    return jnp.transpose(w, (0, 2, 3, 1)).reshape(cout, kh * kw * cin)


# ---------------------------------------------------------------------------
# kernel 1: per-pixel channel matmul + per-channel affine (+ optional ReLU)
#   y[n] = act(scale * (W @ x[n]) + shift),  x[n]: (Cin, HW)
# implements 1x1 conv + folded BN, and (via im2col patches) KxK convs.
# ---------------------------------------------------------------------------

def _matmul_affine_kernel(x_ref, w_ref, scale_ref, shift_ref, o_ref, *, nb, relu):
    w = w_ref[...]
    scale = scale_ref[...]
    shift = shift_ref[...]
    for n in range(nb):                               # static unrolled N-batch
        x = x_ref[n].astype(jnp.float32)              # f32 compute, any storage dtype
        y = jnp.dot(w, x, preferred_element_type=jnp.float32)
        y = y * scale + shift
        if relu:
            y = jnp.maximum(y, 0.0)
        o_ref[n] = y.astype(o_ref.dtype)


def matmul_affine(x_flat, w, scale, shift, *, relu, out_dtype=None):
    n, cin, hw = x_flat.shape
    cout = w.shape[0]
    out_dtype = out_dtype or x_flat.dtype
    itemsize = jnp.dtype(x_flat.dtype).itemsize
    nb = _pick_nb(n, (cin + cout) * hw * itemsize)

    block_bytes = nb * (cin + cout) * hw * itemsize + (cout * cin + 2 * cout) * 4
    cost = pl.CostEstimate(
        flops=2 * n * cout * cin * hw + 2 * n * cout * hw,
        transcendentals=0,
        bytes_accessed=n * (cin + cout) * hw * itemsize + (cout * cin + 2 * cout) * 4,
    )
    kernel = functools.partial(_matmul_affine_kernel, nb=nb, relu=relu)
    return pl.pallas_call(
        kernel,
        out_shape=jax.ShapeDtypeStruct((n, cout, hw), out_dtype),
        grid_spec=pltpu.PrefetchScalarGridSpec(
            num_scalar_prefetch=0,
            grid=(n // nb,),
            in_specs=[
                pl.BlockSpec((nb, cin, hw), lambda i: (i, 0, 0)),
                pl.BlockSpec((cout, cin), lambda i: (0, 0)),   # grid-invariant: DMA'd once
                pl.BlockSpec((cout, 1), lambda i: (0, 0)),
                pl.BlockSpec((cout, 1), lambda i: (0, 0)),
            ],
            out_specs=pl.BlockSpec((nb, cout, hw), lambda i: (i, 0, 0)),
        ),
        compiler_params=_mosaic_params(block_bytes),
        cost_estimate=cost,
    )(x_flat, w, scale.reshape(cout, 1), shift.reshape(cout, 1))


# ---------------------------------------------------------------------------
# kernel 2: CBAM ChannelGate (+ fused channel-wise max/mean for SpatialGate)
# ---------------------------------------------------------------------------

def _channel_gate_kernel(x_ref, w1_ref, b1_ref, w2_ref, b2_ref,
                         o_ref, sp_ref, *, nb, inv_hw):
    w1 = w1_ref[...]
    b1 = b1_ref[...]
    w2 = w2_ref[...]
    b2 = b2_ref[...]
    inv_c = 1.0 / x_ref.shape[1]
    for n in range(nb):
        x = x_ref[n].astype(jnp.float32)                      # (C, HW)
        avg = jnp.sum(x, axis=-1, keepdims=True) * inv_hw     # (C, 1)
        mx = jnp.max(x, axis=-1, keepdims=True)               # (C, 1)
        # Single fused MLP pass over both pooled vectors (perf review):
        v = jnp.concatenate([avg, mx], axis=1)                # (C, 2)
        h = jnp.maximum(jnp.dot(w1, v, preferred_element_type=jnp.float32) + b1, 0.0)
        y = jnp.dot(w2, h, preferred_element_type=jnp.float32) + b2   # (C, 2)
        att = jax.nn.sigmoid(y[:, 0:1] + y[:, 1:2])           # (C, 1)
        g = x * att                                           # (C, HW)
        o_ref[n] = g.astype(o_ref.dtype)
        # Channel-wise max / mean of the gated activations, needed by the
        # SpatialGate that follows -> fused here so x is not re-read from HBM.
        sp = jnp.concatenate(
            [jnp.max(g, axis=0, keepdims=True),
             jnp.sum(g, axis=0, keepdims=True) * inv_c], axis=0)   # (2, HW)
        sp_ref[n] = sp.astype(sp_ref.dtype)


def channel_gate(x_flat, fc1_w, fc1_b, fc2_w, fc2_b):
    n, c, hw = x_flat.shape
    mid = fc1_w.shape[0]
    itemsize = jnp.dtype(x_flat.dtype).itemsize
    nb = _pick_nb(n, 2 * c * hw * itemsize)

    block_bytes = nb * (2 * c + 2) * hw * itemsize + (2 * mid * c + mid + c) * 4
    cost = pl.CostEstimate(
        flops=5 * n * c * hw,          # pooling + gating multiply (tiny matmuls negligible)
        transcendentals=n * c,         # sigmoid
        bytes_accessed=n * (2 * c + 2) * hw * itemsize,
    )
    kernel = functools.partial(_channel_gate_kernel, nb=nb, inv_hw=1.0 / hw)
    return pl.pallas_call(
        kernel,
        out_shape=(jax.ShapeDtypeStruct((n, c, hw), x_flat.dtype),
                   jax.ShapeDtypeStruct((n, 2, hw), jnp.float32)),
        grid_spec=pltpu.PrefetchScalarGridSpec(
            num_scalar_prefetch=0,
            grid=(n // nb,),
            in_specs=[
                pl.BlockSpec((nb, c, hw), lambda i: (i, 0, 0)),
                pl.BlockSpec((mid, c), lambda i: (0, 0)),      # grid-invariant
                pl.BlockSpec((mid, 1), lambda i: (0, 0)),
                pl.BlockSpec((c, mid), lambda i: (0, 0)),
                pl.BlockSpec((c, 1), lambda i: (0, 0)),
            ],
            out_specs=[pl.BlockSpec((nb, c, hw), lambda i: (i, 0, 0)),
                       pl.BlockSpec((nb, 2, hw), lambda i: (i, 0, 0))],
        ),
        compiler_params=_mosaic_params(block_bytes),
        cost_estimate=cost,
    )(x_flat, fc1_w, fc1_b.reshape(mid, 1), fc2_w, fc2_b.reshape(c, 1))


# ---------------------------------------------------------------------------
# kernel 3: out = relu(x * sigmoid(spatial_att) + residual)
# kernel 4: out = relu(x + residual)              (non-CBAM path)
# ---------------------------------------------------------------------------

def _gate_residual_relu_kernel(x_ref, att_ref, res_ref, o_ref, *, nb):
    for n in range(nb):
        att = jax.nn.sigmoid(att_ref[n].astype(jnp.float32))   # (1, HW) broadcast over C
        y = x_ref[n].astype(jnp.float32) * att + res_ref[n].astype(jnp.float32)
        o_ref[n] = jnp.maximum(y, 0.0).astype(o_ref.dtype)


def gate_residual_relu(x_flat, att_logits, residual):
    n, c, hw = x_flat.shape
    itemsize = jnp.dtype(x_flat.dtype).itemsize
    nb = _pick_nb(n, 3 * c * hw * itemsize)
    block_bytes = nb * (3 * c + 1) * hw * itemsize
    cost = pl.CostEstimate(flops=3 * n * c * hw, transcendentals=n * hw,
                           bytes_accessed=n * (3 * c + 1) * hw * itemsize)
    kernel = functools.partial(_gate_residual_relu_kernel, nb=nb)
    return pl.pallas_call(
        kernel,
        out_shape=jax.ShapeDtypeStruct((n, c, hw), x_flat.dtype),
        grid_spec=pltpu.PrefetchScalarGridSpec(
            num_scalar_prefetch=0,
            grid=(n // nb,),
            in_specs=[pl.BlockSpec((nb, c, hw), lambda i: (i, 0, 0)),
                      pl.BlockSpec((nb, 1, hw), lambda i: (i, 0, 0)),
                      pl.BlockSpec((nb, c, hw), lambda i: (i, 0, 0))],
            out_specs=pl.BlockSpec((nb, c, hw), lambda i: (i, 0, 0)),
        ),
        compiler_params=_mosaic_params(block_bytes),
        cost_estimate=cost,
    )(x_flat, att_logits, residual)


def _add_relu_kernel(x_ref, res_ref, o_ref, *, nb):
    for n in range(nb):
        y = x_ref[n].astype(jnp.float32) + res_ref[n].astype(jnp.float32)
        o_ref[n] = jnp.maximum(y, 0.0).astype(o_ref.dtype)


def add_relu(x_flat, residual):
    n, c, hw = x_flat.shape
    itemsize = jnp.dtype(x_flat.dtype).itemsize
    nb = _pick_nb(n, 3 * c * hw * itemsize)
    block_bytes = 3 * nb * c * hw * itemsize
    cost = pl.CostEstimate(flops=2 * n * c * hw, transcendentals=0,
                           bytes_accessed=3 * n * c * hw * itemsize)
    kernel = functools.partial(_add_relu_kernel, nb=nb)
    return pl.pallas_call(
        kernel,
        out_shape=jax.ShapeDtypeStruct((n, c, hw), x_flat.dtype),
        grid_spec=pltpu.PrefetchScalarGridSpec(
            num_scalar_prefetch=0,
            grid=(n // nb,),
            in_specs=[pl.BlockSpec((nb, c, hw), lambda i: (i, 0, 0)),
                      pl.BlockSpec((nb, c, hw), lambda i: (i, 0, 0))],
            out_specs=pl.BlockSpec((nb, c, hw), lambda i: (i, 0, 0)),
        ),
        compiler_params=_mosaic_params(block_bytes),
        cost_estimate=cost,
    )(x_flat, residual)


# ---------------------------------------------------------------------------
# Bottleneck forward (eval-mode BN, optional CBAM, optional 1x1 downsample)
# ---------------------------------------------------------------------------

def bottleneck_forward(x, p, *, stride=1, use_cbam=True, bn_eps=1e-5):
    n, cin, h, w = x.shape
    x_in = x[:, :, ::stride, ::stride] if stride != 1 else x    # 1x1 conv w/ stride == subsample
    ho, wo = x_in.shape[2], x_in.shape[3]
    hw = ho * wo
    assert hw % 128 == 0, "H*W must be a multiple of 128 for the lane-dense layout"
    # TODO(synk): pad + mask the spatial axis for H*W not a multiple of 128 (7x7/14x14 stages).

    planes = p["conv1_w"].shape[0]
    cexp = p["conv3_w"].shape[0]
    x_flat = x_in.reshape(n, cin, hw)

    s1, t1 = _fold_bn(p["bn1_g"], p["bn1_b"], p["bn1_m"], p["bn1_v"], bn_eps)
    s2, t2 = _fold_bn(p["bn2_g"], p["bn2_b"], p["bn2_m"], p["bn2_v"], bn_eps)
    s3, t3 = _fold_bn(p["bn3_g"], p["bn3_b"], p["bn3_m"], p["bn3_v"], bn_eps)

    # conv1 (1x1) + bn1 + relu
    out = matmul_affine(x_flat, p["conv1_w"].reshape(planes, cin), s1, t1, relu=True)
    # conv2 (3x3, pad 1) + bn2 + relu (im2col patches -> channel matmul)
    patches = _im2col(out.reshape(n, planes, ho, wo), 3, 1)
    out = matmul_affine(patches, _conv_weight_as_matrix(p["conv2_w"]), s2, t2, relu=True)
    # conv3 (1x1) + bn3
    out = matmul_affine(out, p["conv3_w"].reshape(cexp, planes), s3, t3, relu=False)

    # residual path
    if p.get("down_w") is not None:
        sd, td = _fold_bn(p["down_bn_g"], p["down_bn_b"], p["down_bn_m"], p["down_bn_v"], bn_eps)
        residual = matmul_affine(x_flat, p["down_w"].reshape(cexp, cin), sd, td, relu=False)
    else:
        assert cin == cexp, "downsample params required when inplanes != planes*4"
        residual = x_flat

    if use_cbam:
        # ChannelGate (also returns channel-wise max/mean of the gated output)
        gated, sp = channel_gate(out, p["cg_fc1_w"], p["cg_fc1_b"],
                                 p["cg_fc2_w"], p["cg_fc2_b"])
        # SpatialGate: 7x7 conv (2 -> 1 channels, pad 3) + BN via im2col + matmul
        ss, ts = _fold_bn(p["sg_bn_g"], p["sg_bn_b"], p["sg_bn_m"], p["sg_bn_v"], bn_eps)
        sp_patches = _im2col(sp.reshape(n, 2, ho, wo), 7, 3)
        att_logits = matmul_affine(sp_patches, _conv_weight_as_matrix(p["sg_conv_w"]),
                                   ss, ts, relu=False)
        out = gate_residual_relu(gated, att_logits, residual)
    else:
        out = add_relu(out, residual)

    return out.reshape(n, cexp, ho, wo)


# ---------------------------------------------------------------------------
# pure-JAX reference (eval-mode BN), for validation
# ---------------------------------------------------------------------------

def _bn_ref(x, g, b, m, v, eps):
    scale = g / jnp.sqrt(v + eps)
    return (x - m[None, :, None, None]) * scale[None, :, None, None] + b[None, :, None, None]


def _conv_ref(x, w, stride=1, padding=0):
    return lax.conv_general_dilated(
        x, w, window_strides=(stride, stride),
        padding=[(padding, padding), (padding, padding)],
        dimension_numbers=("NCHW", "OIHW", "NCHW"),
        precision=lax.Precision.HIGHEST)


def bottleneck_ref(x, p, *, stride=1, use_cbam=True, bn_eps=1e-5):
    residual = x
    out = jax.nn.relu(_bn_ref(_conv_ref(x, p["conv1_w"], stride=stride),
                              p["bn1_g"], p["bn1_b"], p["bn1_m"], p["bn1_v"], bn_eps))
    out = jax.nn.relu(_bn_ref(_conv_ref(out, p["conv2_w"], padding=1),
                              p["bn2_g"], p["bn2_b"], p["bn2_m"], p["bn2_v"], bn_eps))
    out = _bn_ref(_conv_ref(out, p["conv3_w"]),
                  p["bn3_g"], p["bn3_b"], p["bn3_m"], p["bn3_v"], bn_eps)
    if p.get("down_w") is not None:
        residual = _bn_ref(_conv_ref(x, p["down_w"], stride=stride),
                           p["down_bn_g"], p["down_bn_b"], p["down_bn_m"], p["down_bn_v"], bn_eps)
    if use_cbam:
        avg = jnp.mean(out, axis=(2, 3))
        mx = jnp.max(out, axis=(2, 3))

        def mlp(v):
            h = jax.nn.relu(v @ p["cg_fc1_w"].T + p["cg_fc1_b"])
            return h @ p["cg_fc2_w"].T + p["cg_fc2_b"]

        att_c = jax.nn.sigmoid(mlp(avg) + mlp(mx))[:, :, None, None]
        out = out * att_c
        sp = jnp.concatenate([jnp.max(out, axis=1, keepdims=True),
                              jnp.mean(out, axis=1, keepdims=True)], axis=1)
        att_s = _bn_ref(_conv_ref(sp, p["sg_conv_w"], padding=3),
                        p["sg_bn_g"], p["sg_bn_b"], p["sg_bn_m"], p["sg_bn_v"], bn_eps)
        out = out * jax.nn.sigmoid(att_s)
    return jax.nn.relu(out + residual)


# ---------------------------------------------------------------------------
# deterministic parameters + test
# ---------------------------------------------------------------------------

def make_params(key, inplanes, planes, reduction_ratio=16):
    cexp = planes * 4
    mid = cexp // reduction_ratio
    keys = list(jax.random.split(key, 32))
    it = iter(range(32))

    def k():
        return keys[next(it)]

    def bn_params(prefix, c, p):
        p[prefix + "_g"] = jax.random.uniform(k(), (c,), jnp.float32, 0.5, 1.5)
        p[prefix + "_b"] = 0.1 * jax.random.normal(k(), (c,), jnp.float32)
        p[prefix + "_m"] = 0.1 * jax.random.normal(k(), (c,), jnp.float32)
        p[prefix + "_v"] = jax.random.uniform(k(), (c,), jnp.float32, 0.5, 1.5)

    p = {}
    p["conv1_w"] = jax.random.normal(k(), (planes, inplanes, 1, 1), jnp.float32) / math.sqrt(inplanes)
    bn_params("bn1", planes, p)
    p["conv2_w"] = jax.random.normal(k(), (planes, planes, 3, 3), jnp.float32) / math.sqrt(planes * 9)
    bn_params("bn2", planes, p)
    p["conv3_w"] = jax.random.normal(k(), (cexp, planes, 1, 1), jnp.float32) / math.sqrt(planes)
    bn_params("bn3", cexp, p)
    p["cg_fc1_w"] = jax.random.normal(k(), (mid, cexp), jnp.float32) / math.sqrt(cexp)
    p["cg_fc1_b"] = 0.1 * jax.random.normal(k(), (mid,), jnp.float32)
    p["cg_fc2_w"] = jax.random.normal(k(), (cexp, mid), jnp.float32) / math.sqrt(mid)
    p["cg_fc2_b"] = 0.1 * jax.random.normal(k(), (cexp,), jnp.float32)
    p["sg_conv_w"] = jax.random.normal(k(), (1, 2, 7, 7), jnp.float32) / math.sqrt(2 * 49)
    bn_params("sg_bn", 1, p)
    return p


if __name__ == "__main__":
    N, inplanes, planes, H, W = 2, 64, 16, 16, 16   # inplanes == planes*4 -> downsample=None

    key = jax.random.PRNGKey(0)
    kx, kp = jax.random.split(key)
    x = jax.random.normal(kx, (N, inplanes, H, W), dtype=jnp.float32)
    params = make_params(kp, inplanes, planes, reduction_ratio=16)

    fwd_cbam = jax.jit(functools.partial(bottleneck_forward, stride=1, use_cbam=True))
    fwd_plain = jax.jit(functools.partial(bottleneck_forward, stride=1, use_cbam=False))

    out = jax.block_until_ready(fwd_cbam(x, params))
    with jax.default_matmul_precision("highest"):
        ref = bottleneck_ref(x, params, stride=1, use_cbam=True)
    assert out.shape == (N, planes * 4, H, W)
    err = float(jnp.max(jnp.abs(out - ref)))
    assert jnp.allclose(out, ref, atol=2e-3, rtol=2e-3), f"CBAM path mismatch, max|err|={err}"

    out2 = jax.block_until_ready(fwd_plain(x, params))
    with jax.default_matmul_precision("highest"):
        ref2 = bottleneck_ref(x, params, stride=1, use_cbam=False)
    err2 = float(jnp.max(jnp.abs(out2 - ref2)))
    assert jnp.allclose(out2, ref2, atol=2e-3, rtol=2e-3), f"plain path mismatch, max|err|={err2}"

    print("KERNEL_OK")
</pallas_src>

<mosaic_0001>
module attributes {stable_mosaic.version = 11 : i64} {
  func.func @_matmul_affine_kernel(%arg0: i32, %arg1: memref<1x64x256xf32, #tpu.memory_space<vmem>>, %arg2: memref<16x64xf32, #tpu.memory_space<vmem>>, %arg3: memref<16x1xf32, #tpu.memory_space<vmem>>, %arg4: memref<16x1xf32, #tpu.memory_space<vmem>>, %arg5: memref<1x16x256xf32, #tpu.memory_space<vmem>>) attributes {dimension_semantics = [#tpu.dimension_semantics<parallel>], iteration_bounds = array<i64: 2>, scalar_prefetch = 0 : i64, scratch_operands = 0 : i64, tpu.core_type = #tpu.core_type<tc>, window_params = [{transform_indices = @transform_0, window_bounds = array<i64: 1, 64, 256>}, {pipeline_mode = #tpu.pipeline_mode<synchronous>, transform_indices = @transform_1, window_bounds = array<i64: 16, 64>}, {pipeline_mode = #tpu.pipeline_mode<synchronous>, transform_indices = @transform_2, window_bounds = array<i64: 16, 1>}, {pipeline_mode = #tpu.pipeline_mode<synchronous>, transform_indices = @transform_3, window_bounds = array<i64: 16, 1>}, {transform_indices = @transform_4, window_bounds = array<i64: 1, 16, 256>}]} {
    %c0 = arith.constant 0 : index
    %c0_0 = arith.constant 0 : index
    %0 = vector.load %arg2[%c0, %c0_0] : memref<16x64xf32, #tpu.memory_space<vmem>>, vector<16x64xf32>
    %c0_1 = arith.constant 0 : index
    %c0_2 = arith.constant 0 : index
    %1 = vector.load %arg3[%c0_1, %c0_2] : memref<16x1xf32, #tpu.memory_space<vmem>>, vector<16x1xf32>
    %c0_3 = arith.constant 0 : index
    %c0_4 = arith.constant 0 : index
    %2 = vector.load %arg4[%c0_3, %c0_4] : memref<16x1xf32, #tpu.memory_space<vmem>>, vector<16x1xf32>
    %c0_5 = arith.constant 0 : index
    %c0_6 = arith.constant 0 : index
    %c0_7 = arith.constant 0 : index
    %3 = vector.load %arg1[%c0_5, %c0_6, %c0_7] : memref<1x64x256xf32, #tpu.memory_space<vmem>>, vector<1x64x256xf32>
    %4 = vector.shape_cast %3 : vector<1x64x256xf32> to vector<64x256xf32>
    %cst = arith.constant dense<0.000000e+00> : vector<16x256xf32>
    %5 = tpu.matmul %0, %4, %cst {dimension_numbers = #tpu.dot_dimension_numbers<[1], [0], [0], [1], [0, 0, 1, 1], [], []>} : vector<16x64xf32>, vector<64x256xf32>, vector<16x256xf32> -> vector<16x256xf32>
    %6 = vector.broadcast %1 : vector<16x1xf32> to vector<16x256xf32>
    %7 = arith.mulf %5, %6 : vector<16x256xf32>
    %8 = vector.broadcast %2 : vector<16x1xf32> to vector<16x256xf32>
    %9 = arith.addf %7, %8 : vector<16x256xf32>
    %cst_8 = arith.constant 0.000000e+00 : f32
    %10 = vector.broadcast %cst_8 : f32 to vector<16x256xf32>
    %11 = arith.maximumf %9, %10 : vector<16x256xf32>
    %c0_9 = arith.constant 0 : index
    %c0_10 = arith.constant 0 : index
    %c0_11 = arith.constant 0 : index
    %12 = vector.load %arg5[%c0_9, %c0_10, %c0_11] : memref<1x16x256xf32, #tpu.memory_space<vmem>>, vector<1x16x256xf32>
    %13 = vector.shape_cast %12 : vector<1x16x256xf32> to vector<16x256xf32>
    %14 = vector.shape_cast %11 : vector<16x256xf32> to vector<1x16x256xf32>
    tpu.vector_store %arg5[%c0_9, %c0_10, %c0_11], %14 {strides = array<i32>} : memref<1x16x256xf32, #tpu.memory_space<vmem>>, vector<1x16x256xf32>,
    return
  }
  func.func @transform_0(%arg0: i32) -> (i32, i32, i32) {
    %c0_i32 = arith.constant 0 : i32
    %c0_i32_0 = arith.constant 0 : i32
    %c0_i32_1 = arith.constant 0 : i32
    return %arg0, %c0_i32, %c0_i32_0 : i32, i32, i32
  }
  func.func @transform_1(%arg0: i32) -> (i32, i32) {
    %c0_i32 = arith.constant 0 : i32
    %c0_i32_0 = arith.constant 0 : i32
    %c0_i32_1 = arith.constant 0 : i32
    return %c0_i32, %c0_i32_0 : i32, i32
  }
  func.func @transform_2(%arg0: i32) -> (i32, i32) {
    %c0_i32 = arith.constant 0 : i32
    %c0_i32_0 = arith.constant 0 : i32
    %c0_i32_1 = arith.constant 0 : i32
    return %c0_i32, %c0_i32_0 : i32, i32
  }
  func.func @transform_3(%arg0: i32) -> (i32, i32) {
    %c0_i32 = arith.constant 0 : i32
    %c0_i32_0 = arith.constant 0 : i32
    %c0_i32_1 = arith.constant 0 : i32
    return %c0_i32, %c0_i32_0 : i32, i32
  }
  func.func @transform_4(%arg0: i32) -> (i32, i32, i32) {
    %c0_i32 = arith.constant 0 : i32
    %c0_i32_0 = arith.constant 0 : i32
    %c0_i32_1 = arith.constant 0 : i32
    return %arg0, %c0_i32, %c0_i32_0 : i32, i32, i32
  }
}

module attributes {stable_mosaic.version = 11 : i64} {
  func.func @_matmul_affine_kernel(%arg0: i32, %arg1: memref<1x144x256xf32, #tpu.memory_space<vmem>>, %arg2: memref<16x144xf32, #tpu.memory_space<vmem>>, %arg3: memref<16x1xf32, #tpu.memory_space<vmem>>, %arg4: memref<16x1xf32, #tpu.memory_space<vmem>>, %arg5: memref<1x16x256xf32, #tpu.memory_space<vmem>>) attributes {dimension_semantics = [#tpu.dimension_semantics<parallel>], iteration_bounds = array<i64: 2>, scalar_prefetch = 0 : i64, scratch_operands = 0 : i64, tpu.core_type = #tpu.core_type<tc>, window_params = [{transform_indices = @transform_0, window_bounds = array<i64: 1, 144, 256>}, {pipeline_mode = #tpu.pipeline_mode<synchronous>, transform_indices = @transform_1, window_bounds = array<i64: 16, 144>}, {pipeline_mode = #tpu.pipeline_mode<synchronous>, transform_indices = @transform_2, window_bounds = array<i64: 16, 1>}, {pipeline_mode = #tpu.pipeline_mode<synchronous>, transform_indices = @transform_3, window_bounds = array<i64: 16, 1>}, {transform_indices = @transform_4, window_bounds = array<i64: 1, 16, 256>}]} {
    %c0 = arith.constant 0 : index
    %c0_0 = arith.constant 0 : index
    %0 = vector.load %arg2[%c0, %c0_0] : memref<16x144xf32, #tpu.memory_space<vmem>>, vector<16x144xf32>
    %c0_1 = arith.constant 0 : index
    %c0_2 = arith.constant 0 : index
    %1 = vector.load %arg3[%c0_1, %c0_2] : memref<16x1xf32, #tpu.memory_space<vmem>>, vector<16x1xf32>
    %c0_3 = arith.constant 0 : index
    %c0_4 = arith.constant 0 : index
    %2 = vector.load %arg4[%c0_3, %c0_4] : memref<16x1xf32, #tpu.memory_space<vmem>>, vector<16x1xf32>
    %c0_5 = arith.constant 0 : index
    %c0_6 = arith.constant 0 : index
    %c0_7 = arith.constant 0 : index
    %3 = vector.load %arg1[%c0_5, %c0_6, %c0_7] : memref<1x144x256xf32, #tpu.memory_space<vmem>>, vector<1x144x256xf32>
    %4 = vector.shape_cast %3 : vector<1x144x256xf32> to vector<144x256xf32>
    %cst = arith.constant dense<0.000000e+00> : vector<16x256xf32>
    %5 = tpu.matmul %0, %4, %cst {dimension_numbers = #tpu.dot_dimension_numbers<[1], [0], [0], [1], [0, 0, 1, 1], [], []>} : vector<16x144xf32>, vector<144x256xf32>, vector<16x256xf32> -> vector<16x256xf32>
    %6 = vector.broadcast %1 : vector<16x1xf32> to vector<16x256xf32>
    %7 = arith.mulf %5, %6 : vector<16x256xf32>
    %8 = vector.broadcast %2 : vector<16x1xf32> to vector<16x256xf32>
    %9 = arith.addf %7, %8 : vector<16x256xf32>
    %cst_8 = arith.constant 0.000000e+00 : f32
    %10 = vector.broadcast %cst_8 : f32 to vector<16x256xf32>
    %11 = arith.maximumf %9, %10 : vector<16x256xf32>
    %c0_9 = arith.constant 0 : index
    %c0_10 = arith.constant 0 : index
    %c0_11 = arith.constant 0 : index
    %12 = vector.load %arg5[%c0_9, %c0_10, %c0_11] : memref<1x16x256xf32, #tpu.memory_space<vmem>>, vector<1x16x256xf32>
    %13 = vector.shape_cast %12 : vector<1x16x256xf32> to vector<16x256xf32>
    %14 = vector.shape_cast %11 : vector<16x256xf32> to vector<1x16x256xf32>
    tpu.vector_store %arg5[%c0_9, %c0_10, %c0_11], %14 {strides = array<i32>} : memref<1x16x256xf32, #tpu.memory_space<vmem>>, vector<1x16x256xf32>,
    return
  }
  func.func @transform_0(%arg0: i32) -> (i32, i32, i32) {
    %c0_i32 = arith.constant 0 : i32
    %c0_i32_0 = arith.constant 0 : i32
    %c0_i32_1 = arith.constant 0 : i32
    return %arg0, %c0_i32, %c0_i32_0 : i32, i32, i32
  }
  func.func @transform_1(%arg0: i32) -> (i32, i32) {
    %c0_i32 = arith.constant 0 : i32
    %c0_i32_0 = arith.constant 0 : i32
    %c0_i32_1 = arith.constant 0 : i32
    return %c0_i32, %c0_i32_0 : i32, i32
  }
  func.func @transform_2(%arg0: i32) -> (i32, i32) {
    %c0_i32 = arith.constant 0 : i32
    %c0_i32_0 = arith.constant 0 : i32
    %c0_i32_1 = arith.constant 0 : i32
    return %c0_i32, %c0_i32_0 : i32, i32
  }
  func.func @transform_3(%arg0: i32) -> (i32, i32) {
    %c0_i32 = arith.constant 0 : i32
    %c0_i32_0 = arith.constant 0 : i32
    %c0_i32_1 = arith.constant 0 : i32
    return %c0_i32, %c0_i32_0 : i32, i32
  }
  func.func @transform_4(%arg0: i32) -> (i32, i32, i32) {
    %c0_i32 = arith.constant 0 : i32
    %c0_i32_0 = arith.constant 0 : i32
    %c0_i32_1 = arith.constant 0 : i32
    return %arg0, %c0_i32, %c0_i32_0 : i32, i32, i32
  }
}

module attributes {stable_mosaic.version = 11 : i64} {
  func.func @_matmul_affine_kernel(%arg0: i32, %arg1: memref<1x16x256xf32, #tpu.memory_space<vmem>>, %arg2: memref<64x16xf32, #tpu.memory_space<vmem>>, %arg3: memref<64x1xf32, #tpu.memory_space<vmem>>, %arg4: memref<64x1xf32, #tpu.memory_space<vmem>>, %arg5: memref<1x64x256xf32, #tpu.memory_space<vmem>>) attributes {dimension_semantics = [#tpu.dimension_semantics<parallel>], iteration_bounds = array<i64: 2>, scalar_prefetch = 0 : i64, scratch_operands = 0 : i64, tpu.core_type = #tpu.core_type<tc>, window_params = [{transform_indices = @transform_0, window_bounds = array<i64: 1, 16, 256>}, {pipeline_mode = #tpu.pipeline_mode<synchronous>, transform_indices = @transform_1, window_bounds = array<i64: 64, 16>}, {pipeline_mode = #tpu.pipeline_mode<synchronous>, transform_indices = @transform_2, window_bounds = array<i64: 64, 1>}, {pipeline_mode = #tpu.pipeline_mode<synchronous>, transform_indices = @transform_3, window_bounds = array<i64: 64, 1>}, {transform_indices = @transform_4, window_bounds = array<i64: 1, 64, 256>}]} {
    %c0 = arith.constant 0 : index
    %c0_0 = arith.constant 0 : index
    %0 = vector.load %arg2[%c0, %c0_0] : memref<64x16xf32, #tpu.memory_space<vmem>>, vector<64x16xf32>
    %c0_1 = arith.constant 0 : index
    %c0_2 = arith.constant 0 : index
    %1 = vector.load %arg3[%c0_1, %c0_2] : memref<64x1xf32, #tpu.memory_space<vmem>>, vector<64x1xf32>
    %c0_3 = arith.constant 0 : index
    %c0_4 = arith.constant 0 : index
    %2 = vector.load %arg4[%c0_3, %c0_4] : memref<64x1xf32, #tpu.memory_space<vmem>>, vector<64x1xf32>
    %c0_5 = arith.constant 0 : index
    %c0_6 = arith.constant 0 : index
    %c0_7 = arith.constant 0 : index
    %3 = vector.load %arg1[%c0_5, %c0_6, %c0_7] : memref<1x16x256xf32, #tpu.memory_space<vmem>>, vector<1x16x256xf32>
    %4 = vector.shape_cast %3 : vector<1x16x256xf32> to vector<16x256xf32>
    %cst = arith.constant dense<0.000000e+00> : vector<64x256xf32>
    %5 = tpu.matmul %0, %4, %cst {dimension_numbers = #tpu.dot_dimension_numbers<[1], [0], [0], [1], [0, 0, 1, 1], [], []>} : vector<64x16xf32>, vector<16x256xf32>, vector<64x256xf32> -> vector<64x256xf32>
    %6 = vector.broadcast %1 : vector<64x1xf32> to vector<64x256xf32>
    %7 = arith.mulf %5, %6 : vector<64x256xf32>
    %8 = vector.broadcast %2 : vector<64x1xf32> to vector<64x256xf32>
    %9 = arith.addf %7, %8 : vector<64x256xf32>
    %c0_8 = arith.constant 0 : index
    %c0_9 = arith.constant 0 : index
    %c0_10 = arith.constant 0 : index
    %10 = vector.load %arg5[%c0_8, %c0_9, %c0_10] : memref<1x64x256xf32, #tpu.memory_space<vmem>>, vector<1x64x256xf32>
    %11 = vector.shape_cast %10 : vector<1x64x256xf32> to vector<64x256xf32>
    %12 = vector.shape_cast %9 : vector<64x256xf32> to vector<1x64x256xf32>
    tpu.vector_store %arg5[%c0_8, %c0_9, %c0_10], %12 {strides = array<i32>} : memref<1x64x256xf32, #tpu.memory_space<vmem>>, vector<1x64x256xf32>,
    return
  }
  func.func @transform_0(%arg0: i32) -> (i32, i32, i32) {
    %c0_i32 = arith.constant 0 : i32
    %c0_i32_0 = arith.constant 0 : i32
    %c0_i32_1 = arith.constant 0 : i32
    return %arg0, %c0_i32, %c0_i32_0 : i32, i32, i32
  }
  func.func @transform_1(%arg0: i32) -> (i32, i32) {
    %c0_i32 = arith.constant 0 : i32
    %c0_i32_0 = arith.constant 0 : i32
    %c0_i32_1 = arith.constant 0 : i32
    return %c0_i32, %c0_i32_0 : i32, i32
  }
  func.func @transform_2(%arg0: i32) -> (i32, i32) {
    %c0_i32 = arith.constant 0 : i32
    %c0_i32_0 = arith.constant 0 : i32
    %c0_i32_1 = arith.constant 0 : i32
    return %c0_i32, %c0_i32_0 : i32, i32
  }
  func.func @transform_3(%arg0: i32) -> (i32, i32) {
    %c0_i32 = arith.constant 0 : i32
    %c0_i32_0 = arith.constant 0 : i32
    %c0_i32_1 = arith.constant 0 : i32
    return %c0_i32, %c0_i32_0 : i32, i32
  }
  func.func @transform_4(%arg0: i32) -> (i32, i32, i32) {
    %c0_i32 = arith.constant 0 : i32
    %c0_i32_0 = arith.constant 0 : i32
    %c0_i32_1 = arith.constant 0 : i32
    return %arg0, %c0_i32, %c0_i32_0 : i32, i32, i32
  }
}

module attributes {stable_mosaic.version = 11 : i64} {
  func.func @_channel_gate_kernel(%arg0: i32, %arg1: memref<1x64x256xf32, #tpu.memory_space<vmem>>, %arg2: memref<4x64xf32, #tpu.memory_space<vmem>>, %arg3: memref<4x1xf32, #tpu.memory_space<vmem>>, %arg4: memref<64x4xf32, #tpu.memory_space<vmem>>, %arg5: memref<64x1xf32, #tpu.memory_space<vmem>>, %arg6: memref<1x64x256xf32, #tpu.memory_space<vmem>>, %arg7: memref<1x2x256xf32, #tpu.memory_space<vmem>>) attributes {dimension_semantics = [#tpu.dimension_semantics<parallel>], iteration_bounds = array<i64: 2>, scalar_prefetch = 0 : i64, scratch_operands = 0 : i64, tpu.core_type = #tpu.core_type<tc>, window_params = [{transform_indices = @transform_0, window_bounds = array<i64: 1, 64, 256>}, {pipeline_mode = #tpu.pipeline_mode<synchronous>, transform_indices = @transform_1, window_bounds = array<i64: 4, 64>}, {pipeline_mode = #tpu.pipeline_mode<synchronous>, transform_indices = @transform_2, window_bounds = array<i64: 4, 1>}, {pipeline_mode = #tpu.pipeline_mode<synchronous>, transform_indices = @transform_3, window_bounds = array<i64: 64, 4>}, {pipeline_mode = #tpu.pipeline_mode<synchronous>, transform_indices = @transform_4, window_bounds = array<i64: 64, 1>}, {transform_indices = @transform_5, window_bounds = array<i64: 1, 64, 256>}, {transform_indices = @transform_6, window_bounds = array<i64: 1, 2, 256>}]} {
    %c0 = arith.constant 0 : index
    %c0_0 = arith.constant 0 : index
    %0 = vector.load %arg2[%c0, %c0_0] : memref<4x64xf32, #tpu.memory_space<vmem>>, vector<4x64xf32>
    %c0_1 = arith.constant 0 : index
    %c0_2 = arith.constant 0 : index
    %1 = vector.load %arg3[%c0_1, %c0_2] : memref<4x1xf32, #tpu.memory_space<vmem>>, vector<4x1xf32>
    %c0_3 = arith.constant 0 : index
    %c0_4 = arith.constant 0 : index
    %2 = vector.load %arg4[%c0_3, %c0_4] : memref<64x4xf32, #tpu.memory_space<vmem>>, vector<64x4xf32>
    %c0_5 = arith.constant 0 : index
    %c0_6 = arith.constant 0 : index
    %3 = vector.load %arg5[%c0_5, %c0_6] : memref<64x1xf32, #tpu.memory_space<vmem>>, vector<64x1xf32>
    %c0_7 = arith.constant 0 : index
    %c0_8 = arith.constant 0 : index
    %c0_9 = arith.constant 0 : index
    %4 = vector.load %arg1[%c0_7, %c0_8, %c0_9] : memref<1x64x256xf32, #tpu.memory_space<vmem>>, vector<1x64x256xf32>
    %5 = vector.shape_cast %4 : vector<1x64x256xf32> to vector<64x256xf32>
    %cst = arith.constant dense<0.000000e+00> : vector<64xf32>
    %6 = vector.multi_reduction <add>, %5, %cst [1] : vector<64x256xf32> to vector<64xf32>
    %7 = vector.shape_cast %6 : vector<64xf32> to vector<64x1xf32>
    %cst_10 = arith.constant 3.906250e-03 : f32
    %8 = vector.broadcast %cst_10 : f32 to vector<64x1xf32>
    %9 = arith.mulf %7, %8 : vector<64x1xf32>
    %cst_11 = arith.constant dense<0xFF800000> : vector<64xf32>
    %10 = vector.multi_reduction <maximumf>, %5, %cst_11 [1] : vector<64x256xf32> to vector<64xf32>
    %11 = vector.shape_cast %10 : vector<64xf32> to vector<64x1xf32>
    %12 = tpu.concatenate %9, %11 in 1 : vector<64x1xf32>, vector<64x1xf32> -> vector<64x2xf32>
    %cst_12 = arith.constant dense<0.000000e+00> : vector<4x2xf32>
    %13 = tpu.matmul %0, %12, %cst_12 {dimension_numbers = #tpu.dot_dimension_numbers<[1], [0], [0], [1], [0, 0, 1, 1], [], []>} : vector<4x64xf32>, vector<64x2xf32>, vector<4x2xf32> -> vector<4x2xf32>
    %14 = vector.broadcast %1 : vector<4x1xf32> to vector<4x2xf32>
    %15 = arith.addf %13, %14 : vector<4x2xf32>
    %cst_13 = arith.constant 0.000000e+00 : f32
    %16 = vector.broadcast %cst_13 : f32 to vector<4x2xf32>
    %17 = arith.maximumf %15, %16 : vector<4x2xf32>
    %cst_14 = arith.constant dense<0.000000e+00> : vector<64x2xf32>
    %18 = tpu.matmul %2, %17, %cst_14 {dimension_numbers = #tpu.dot_dimension_numbers<[1], [0], [0], [1], [0, 0, 1, 1], [], []>} : vector<64x4xf32>, vector<4x2xf32>, vector<64x2xf32> -> vector<64x2xf32>
    %19 = vector.broadcast %3 : vector<64x1xf32> to vector<64x2xf32>
    %20 = arith.addf %18, %19 : vector<64x2xf32>
    %21 = vector.extract_strided_slice %20 {offsets = [0, 0], sizes = [64, 1], strides = [1, 1]} : vector<64x2xf32> to vector<64x1xf32>
    %22 = vector.extract_strided_slice %20 {offsets = [0, 1], sizes = [64, 1], strides = [1, 1]} : vector<64x2xf32> to vector<64x1xf32>
    %23 = arith.addf %21, %22 : vector<64x1xf32>
    %24 = arith.negf %23 : vector<64x1xf32>
    %25 = math.exp %24 : vector<64x1xf32>
    %cst_15 = arith.constant 1.000000e+00 : f32
    %26 = vector.broadcast %cst_15 : f32 to vector<64x1xf32>
    %27 = arith.addf %26, %25 : vector<64x1xf32>
    %28 = arith.divf %26, %27 : vector<64x1xf32>
    %29 = vector.broadcast %28 : vector<64x1xf32> to vector<64x256xf32>
    %30 = arith.mulf %5, %29 : vector<64x256xf32>
    %c0_16 = arith.constant 0 : index
    %c0_17 = arith.constant 0 : index
    %c0_18 = arith.constant 0 : index
    %31 = vector.load %arg6[%c0_16, %c0_17, %c0_18] : memref<1x64x256xf32, #tpu.memory_space<vmem>>, vector<1x64x256xf32>
    %32 = vector.shape_cast %31 : vector<1x64x256xf32> to vector<64x256xf32>
    %33 = vector.shape_cast %30 : vector<64x256xf32> to vector<1x64x256xf32>
    tpu.vector_store %arg6[%c0_16, %c0_17, %c0_18], %33 {strides = array<i32>} : memref<1x64x256xf32, #tpu.memory_space<vmem>>, vector<1x64x256xf32>,
    %cst_19 = arith.constant dense<0xFF800000> : vector<256xf32>
    %34 = vector.multi_reduction <maximumf>, %30, %cst_19 [0] : vector<64x256xf32> to vector<256xf32>
    %35 = vector.shape_cast %34 : vector<256xf32> to vector<1x256xf32>
    %cst_20 = arith.constant dense<0.000000e+00> : vector<256xf32>
    %36 = vector.multi_reduction <add>, %30, %cst_20 [0] : vector<64x256xf32> to vector<256xf32>
    %37 = vector.shape_cast %36 : vector<256xf32> to vector<1x256xf32>
    %cst_21 = arith.constant 1.562500e-02 : f32
    %38 = vector.broadcast %cst_21 : f32 to vector<1x256xf32>
    %39 = arith.mulf %37, %38 : vector<1x256xf32>
    %40 = tpu.concatenate %35, %39 in 0 : vector<1x256xf32>, vector<1x256xf32> -> vector<2x256xf32>
    %c0_22 = arith.constant 0 : index
    %c0_23 = arith.constant 0 : index
    %c0_24 = arith.constant 0 : index
    %41 = vector.load %arg7[%c0_22, %c0_23, %c0_24] : memref<1x2x256xf32, #tpu.memory_space<vmem>>, vector<1x2x256xf32>
    %42 = vector.shape_cast %41 : vector<1x2x256xf32> to vector<2x256xf32>
    %43 = vector.shape_cast %40 : vector<2x256xf32> to vector<1x2x256xf32>
    tpu.vector_store %arg7[%c0_22, %c0_23, %c0_24], %43 {strides = array<i32>} : memref<1x2x256xf32, #tpu.memory_space<vmem>>, vector<1x2x256xf32>,
    return
  }
  func.func @transform_0(%arg0: i32) -> (i32, i32, i32) {
    %c0_i32 = arith.constant 0 : i32
    %c0_i32_0 = arith.constant 0 : i32
    %c0_i32_1 = arith.constant 0 : i32
    return %arg0, %c0_i32, %c0_i32_0 : i32, i32, i32
  }
  func.func @transform_1(%arg0: i32) -> (i32, i32) {
    %c0_i32 = arith.constant 0 : i32
    %c0_i32_0 = arith.constant 0 : i32
    %c0_i32_1 = arith.constant 0 : i32
    return %c0_i32, %c0_i32_0 : i32, i32
  }
  func.func @transform_2(%arg0: i32) -> (i32, i32) {
    %c0_i32 = arith.constant 0 : i32
    %c0_i32_0 = arith.constant 0 : i32
    %c0_i32_1 = arith.constant 0 : i32
    return %c0_i32, %c0_i32_0 : i32, i32
  }
  func.func @transform_3(%arg0: i32) -> (i32, i32) {
    %c0_i32 = arith.constant 0 : i32
    %c0_i32_0 = arith.constant 0 : i32
    %c0_i32_1 = arith.constant 0 : i32
    return %c0_i32, %c0_i32_0 : i32, i32
  }
  func.func @transform_4(%arg0: i32) -> (i32, i32) {
    %c0_i32 = arith.constant 0 : i32
    %c0_i32_0 = arith.constant 0 : i32
    %c0_i32_1 = arith.constant 0 : i32
    return %c0_i32, %c0_i32_0 : i32, i32
  }
  func.func @transform_5(%arg0: i32) -> (i32, i32, i32) {
    %c0_i32 = arith.constant 0 : i32
    %c0_i32_0 = arith.constant 0 : i32
    %c0_i32_1 = arith.constant 0 : i32
    return %arg0, %c0_i32, %c0_i32_0 : i32, i32, i32
  }
  func.func @transform_6(%arg0: i32) -> (i32, i32, i32) {
    %c0_i32 = arith.constant 0 : i32
    %c0_i32_0 = arith.constant 0 : i32
    %c0_i32_1 = arith.constant 0 : i32
    return %arg0, %c0_i32, %c0_i32_0 : i32, i32, i32
  }
}

module attributes {stable_mosaic.version = 11 : i64} {
  func.func @_gate_residual_relu_kernel(%arg0: i32, %arg1: memref<1x64x256xf32, #tpu.memory_space<vmem>>, %arg2: memref<1x1x256xf32, #tpu.memory_space<vmem>>, %arg3: memref<1x64x256xf32, #tpu.memory_space<vmem>>, %arg4: memref<1x64x256xf32, #tpu.memory_space<vmem>>) attributes {dimension_semantics = [#tpu.dimension_semantics<parallel>], iteration_bounds = array<i64: 2>, scalar_prefetch = 0 : i64, scratch_operands = 0 : i64, tpu.core_type = #tpu.core_type<tc>, window_params = [{transform_indices = @transform_0, window_bounds = array<i64: 1, 64, 256>}, {transform_indices = @transform_1, window_bounds = array<i64: 1, 1, 256>}, {transform_indices = @transform_2, window_bounds = array<i64: 1, 64, 256>}, {transform_indices = @transform_3, window_bounds = array<i64: 1, 64, 256>}]} {
    %c0 = arith.constant 0 : index
    %c0_0 = arith.constant 0 : index
    %c0_1 = arith.constant 0 : index
    %0 = vector.load %arg2[%c0, %c0_0, %c0_1] : memref<1x1x256xf32, #tpu.memory_space<vmem>>, vector<1x1x256xf32>
    %1 = vector.shape_cast %0 : vector<1x1x256xf32> to vector<1x256xf32>
    %2 = arith.negf %1 : vector<1x256xf32>
    %3 = math.exp %2 : vector<1x256xf32>
    %cst = arith.constant 1.000000e+00 : f32
    %4 = vector.broadcast %cst : f32 to vector<1x256xf32>
    %5 = arith.addf %4, %3 : vector<1x256xf32>
    %6 = arith.divf %4, %5 : vector<1x256xf32>
    %c0_2 = arith.constant 0 : index
    %c0_3 = arith.constant 0 : index
    %c0_4 = arith.constant 0 : index
    %7 = vector.load %arg1[%c0_2, %c0_3, %c0_4] : memref<1x64x256xf32, #tpu.memory_space<vmem>>, vector<1x64x256xf32>
    %8 = vector.shape_cast %7 : vector<1x64x256xf32> to vector<64x256xf32>
    %9 = vector.broadcast %6 : vector<1x256xf32> to vector<64x256xf32>
    %10 = arith.mulf %8, %9 : vector<64x256xf32>
    %c0_5 = arith.constant 0 : index
    %c0_6 = arith.constant 0 : index
    %c0_7 = arith.constant 0 : index
    %11 = vector.load %arg3[%c0_5, %c0_6, %c0_7] : memref<1x64x256xf32, #tpu.memory_space<vmem>>, vector<1x64x256xf32>
    %12 = vector.shape_cast %11 : vector<1x64x256xf32> to vector<64x256xf32>
    %13 = arith.addf %10, %12 : vector<64x256xf32>
    %cst_8 = arith.constant 0.000000e+00 : f32
    %14 = vector.broadcast %cst_8 : f32 to vector<64x256xf32>
    %15 = arith.maximumf %13, %14 : vector<64x256xf32>
    %c0_9 = arith.constant 0 : index
    %c0_10 = arith.constant 0 : index
    %c0_11 = arith.constant 0 : index
    %16 = vector.load %arg4[%c0_9, %c0_10, %c0_11] : memref<1x64x256xf32, #tpu.memory_space<vmem>>, vector<1x64x256xf32>
    %17 = vector.shape_cast %16 : vector<1x64x256xf32> to vector<64x256xf32>
    %18 = vector.shape_cast %15 : vector<64x256xf32> to vector<1x64x256xf32>
    tpu.vector_store %arg4[%c0_9, %c0_10, %c0_11], %18 {strides = array<i32>} : memref<1x64x256xf32, #tpu.memory_space<vmem>>, vector<1x64x256xf32>,
    return
  }
  func.func @transform_0(%arg0: i32) -> (i32, i32, i32) {
    %c0_i32 = arith.constant 0 : i32
    %c0_i32_0 = arith.constant 0 : i32
    %c0_i32_1 = arith.constant 0 : i32
    return %arg0, %c0_i32, %c0_i32_0 : i32, i32, i32
  }
  func.func @transform_1(%arg0: i32) -> (i32, i32, i32) {
    %c0_i32 = arith.constant 0 : i32
    %c0_i32_0 = arith.constant 0 : i32
    %c0_i32_1 = arith.constant 0 : i32
    return %arg0, %c0_i32, %c0_i32_0 : i32, i32, i32
  }
  func.func @transform_2(%arg0: i32) -> (i32, i32, i32) {
    %c0_i32 = arith.constant 0 : i32
    %c0_i32_0 = arith.constant 0 : i32
    %c0_i32_1 = arith.constant 0 : i32
    return %arg0, %c0_i32, %c0_i32_0 : i32, i32, i32
  }
  func.func @transform_3(%arg0: i32) -> (i32, i32, i32) {
    %c0_i32 = arith.constant 0 : i32
    %c0_i32_0 = arith.constant 0 : i32
    %c0_i32_1 = arith.constant 0 : i32
    return %arg0, %c0_i32, %c0_i32_0 : i32, i32, i32
  }
}

module attributes {stable_mosaic.version = 11 : i64} {
  func.func @_matmul_affine_kernel(%arg0: i32, %arg1: memref<1x98x256xf32, #tpu.memory_space<vmem>>, %arg2: memref<1x98xf32, #tpu.memory_space<vmem>>, %arg3: memref<1x1xf32, #tpu.memory_space<vmem>>, %arg4: memref<1x1xf32, #tpu.memory_space<vmem>>, %arg5: memref<1x1x256xf32, #tpu.memory_space<vmem>>) attributes {dimension_semantics = [#tpu.dimension_semantics<parallel>], iteration_bounds = array<i64: 2>, scalar_prefetch = 0 : i64, scratch_operands = 0 : i64, tpu.core_type = #tpu.core_type<tc>, window_params = [{transform_indices = @transform_0, window_bounds = array<i64: 1, 98, 256>}, {pipeline_mode = #tpu.pipeline_mode<synchronous>, transform_indices = @transform_1, window_bounds = array<i64: 1, 98>}, {pipeline_mode = #tpu.pipeline_mode<synchronous>, transform_indices = @transform_2, window_bounds = array<i64: 1, 1>}, {pipeline_mode = #tpu.pipeline_mode<synchronous>, transform_indices = @transform_3, window_bounds = array<i64: 1, 1>}, {transform_indices = @transform_4, window_bounds = array<i64: 1, 1, 256>}]} {
    %c0 = arith.constant 0 : index
    %c0_0 = arith.constant 0 : index
    %0 = vector.load %arg2[%c0, %c0_0] : memref<1x98xf32, #tpu.memory_space<vmem>>, vector<1x98xf32>
    %c0_1 = arith.constant 0 : index
    %c0_2 = arith.constant 0 : index
    %1 = vector.load %arg3[%c0_1, %c0_2] : memref<1x1xf32, #tpu.memory_space<vmem>>, vector<1x1xf32>
    %c0_3 = arith.constant 0 : index
    %c0_4 = arith.constant 0 : index
    %2 = vector.load %arg4[%c0_3, %c0_4] : memref<1x1xf32, #tpu.memory_space<vmem>>, vector<1x1xf32>
    %c0_5 = arith.constant 0 : index
    %c0_6 = arith.constant 0 : index
    %c0_7 = arith.constant 0 : index
    %3 = vector.load %arg1[%c0_5, %c0_6, %c0_7] : memref<1x98x256xf32, #tpu.memory_space<vmem>>, vector<1x98x256xf32>
    %4 = vector.shape_cast %3 : vector<1x98x256xf32> to vector<98x256xf32>
    %cst = arith.constant dense<0.000000e+00> : vector<1x256xf32>
    %5 = tpu.matmul %0, %4, %cst {dimension_numbers = #tpu.dot_dimension_numbers<[1], [0], [0], [1], [0, 0, 1, 1], [], []>} : vector<1x98xf32>, vector<98x256xf32>, vector<1x256xf32> -> vector<1x256xf32>
    %6 = vector.broadcast %1 : vector<1x1xf32> to vector<1x256xf32>
    %7 = arith.mulf %5, %6 : vector<1x256xf32>
    %8 = vector.broadcast %2 : vector<1x1xf32> to vector<1x256xf32>
    %9 = arith.addf %7, %8 : vector<1x256xf32>
    %c0_8 = arith.constant 0 : index
    %c0_9 = arith.constant 0 : index
    %c0_10 = arith.constant 0 : index
    %10 = vector.load %arg5[%c0_8, %c0_9, %c0_10] : memref<1x1x256xf32, #tpu.memory_space<vmem>>, vector<1x1x256xf32>
    %11 = vector.shape_cast %10 : vector<1x1x256xf32> to vector<1x256xf32>
    %12 = vector.shape_cast %9 : vector<1x256xf32> to vector<1x1x256xf32>
    tpu.vector_store %arg5[%c0_8, %c0_9, %c0_10], %12 {strides = array<i32>} : memref<1x1x256xf32, #tpu.memory_space<vmem>>, vector<1x1x256xf32>,
    return
  }
  func.func @transform_0(%arg0: i32) -> (i32, i32, i32) {
    %c0_i32 = arith.constant 0 : i32
    %c0_i32_0 = arith.constant 0 : i32
    %c0_i32_1 = arith.constant 0 : i32
    return %arg0, %c0_i32, %c0_i32_0 : i32, i32, i32
  }
  func.func @transform_1(%arg0: i32) -> (i32, i32) {
    %c0_i32 = arith.constant 0 : i32
    %c0_i32_0 = arith.constant 0 : i32
    %c0_i32_1 = arith.constant 0 : i32
    return %c0_i32, %c0_i32_0 : i32, i32
  }
  func.func @transform_2(%arg0: i32) -> (i32, i32) {
    %c0_i32 = arith.constant 0 : i32
    %c0_i32_0 = arith.constant 0 : i32
    %c0_i32_1 = arith.constant 0 : i32
    return %c0_i32, %c0_i32_0 : i32, i32
  }
  func.func @transform_3(%arg0: i32) -> (i32, i32) {
    %c0_i32 = arith.constant 0 : i32
    %c0_i32_0 = arith.constant 0 : i32
    %c0_i32_1 = arith.constant 0 : i32
    return %c0_i32, %c0_i32_0 : i32, i32
  }
  func.func @transform_4(%arg0: i32) -> (i32, i32, i32) {
    %c0_i32 = arith.constant 0 : i32
    %c0_i32_0 = arith.constant 0 : i32
    %c0_i32_1 = arith.constant 0 : i32
    return %arg0, %c0_i32, %c0_i32_0 : i32, i32, i32
  }
}

</mosaic_0001>

<bundles_post_ra>
// kernel: bottleneck_forward.6
= control target key start
LH: loop header
LB: loop body
LE: loop exit
PB: predicated region body
PF: predicated region fallthrough
CT: control target
= control target key end

     0   :  { %s481_s15 = smov 0   ;;  %s538_s0 = inlined_call_operand.vmem [shape: f32[2,64,256], index: 0, kind: input, shape index: {}]   ;;  %s539_s1 = inlined_call_operand.vmem [shape: f32[16,64], index: 1, kind: input, shape index: {}]   ;;  %s540_s2 = inlined_call_operand.vmem [shape: f32[16,1], index: 2, kind: input, shape index: {}]   ;;  %s541_s3 = inlined_call_operand.vmem [shape: f32[16,1], index: 3, kind: input, shape index: {}]   ;;  %s542_s4 = inlined_call_operand.vmem [shape: f32[2,16,256], index: 4, kind: output, shape index: {}]  }
   0x1 LB: > { %s395_s16 = sadd.s32 4294967295, %s452_s15   ;;  %p399_p0 = scmp.ge.s32.totalorder %s452_s15, 1  ;;  %s452_s15 = sphi %s481_s15, %s14_s15  }
   0x2   : > { %p162_p1 = scmp.lt.s32.totalorder %s452_s15, 3 }
   0x4   : > { %p163_p2 = pnand %p399_p0, %p162_p1 }
   0x5   : > { %p188_p3 = scmp.lt.s32.totalorder (!%p163_p2), %s395_s16, 1  ;;  %v454_v0 = vmov (!%p163_p2), 0.0   ;;  %v200_v1 = vld [vmem:[%s540_s2] sm:$0xff] (!%p163_p2)  ;;  %v455_v3 = vmov (!%p163_p2), 0   ;;  %v201_v4 = vld [vmem:[%s540_s2 + $0x8] sm:$0xff] (!%p163_p2)  ;;  %vm220_vm0 = vcmask (!%p163_p2), 523264  }
   0x6   : > { %166 = sbr.rel (%p163_p2) target bundleno = 255 (0xff), region = 36  ;;  %291 = vmatprep.mubr.f32.mxu0 (!%p163_p2), %v454_v0  ;;  %297 = vmatprep.mubr.f32.mxu1 (!%p163_p2), %v454_v0  ;;  %v202_v2 = vld [vmem:[%s541_s3] sm:$0xff] (!%p163_p2)  ;;  %v203_v5 = vld [vmem:[%s541_s3 + $0x8] sm:$0xff] (!%p163_p2) }
   0x7   : > { %444 = vset.pattern.permute.xlu0 (!%p163_p2), %v455_v3  ;;  %445 = vset.pattern.permute.xlu1 (!%p163_p2), %v455_v3  ;;  %v198_v30 = vld [vmem:[%s539_s1] sm:$0xff] (!%p163_p2)  ;;  %v199_v31 = vld [vmem:[%s539_s1 + $0x8] sm:$0xff] (!%p163_p2) }
   0x8   : > { %306 = vperm.xlu0 (!%p163_p2), %444, %v200_v1   ;;  %320 = vperm.xlu1 (!%p163_p2), %445, %v202_v2  }
   0xc   : > { %311 = vperm.xlu0 (!%p163_p2), %444, %v201_v4   ;;  %325 = vperm.xlu1 (!%p163_p2), %445, %v203_v5  }
   0xd   : > { %s544_s16 = smov (!%p188_p3, %s395_s16), 1 }
   0xe   : > { %s408_s21 = sshll.u32 %s544_s16, 7  ;;  %s409_s7 = sshll.u32 %s544_s16, 5 }
   0xf   : > { %s507_s28 = scalar_lea.vmem %s538_s0, %s408_s21  ;;  %s197_s10 = scalar_lea.vmem %s542_s4, %s409_s7 }
  0x10   : > { %v205_v6 = vld [vmem:[%s507_s28 + $0x8] sm:$0xff]  ;;  %v207_v7 = vld [vmem:[%s507_s28 + $0x18] sm:$0xff]  ;;  %v204_v8 = vld [vmem:[%s507_s28] sm:$0xff] }
  0x11   : > { %v410_v9 = vpack.c.bf16 %v207_v7, %v205_v6  ;;  %v206_v10 = vld [vmem:[%s507_s28 + $0x10] sm:$0xff]  ;;  %v209_v11 = vld [vmem:[%s507_s28 + $0x28] sm:$0xff]  ;;  %v211_v12 = vld [vmem:[%s507_s28 + $0x38] sm:$0xff] }
  0x12   : > { %v412_v13 = vpack.c.bf16 %v206_v10, %v204_v8  ;;  %v414_v14 = vpack.c.bf16 %v211_v12, %v209_v11  ;;  %v208_v15 = vld [vmem:[%s507_s28 + $0x20] sm:$0xff]  ;;  %v210_v16 = vld [vmem:[%s507_s28 + $0x30] sm:$0xff]  ;;  %v213_v17 = vld [vmem:[%s507_s28 + $0x48] sm:$0xff] }
  0x13   : > { %411 = vmatprep.subr.bf16.mxu0 %v410_v9  ;;  %426 = vmatprep.subr.bf16.mxu1 %v410_v9  ;;  %v215_v18 = vld [vmem:[%s507_s28 + $0x58] sm:$0xff]  ;;  %v416_v19 = vpack.c.bf16 %v210_v16, %v208_v15  ;;  %v212_v21 = vld [vmem:[%s507_s28 + $0x40] sm:$0xff]  ;;  %v214_v22 = vld [vmem:[%s507_s28 + $0x50] sm:$0xff] }
  0x14   : > { %413 = vmatpush1.bf16.msra.mxu0 %v412_v13  ;;  %430 = vmatpush1.bf16.msra.mxu1 %v412_v13  ;;  %v418_v20 = vpack.c.bf16 %v215_v18, %v213_v17  ;;  %v217_v23 = vld [vmem:[%s507_s28 + $0x68] sm:$0xff]  ;;  %v219_v24 = vld [vmem:[%s507_s28 + $0x78] sm:$0xff]  ;;  %v420_v25 = vpack.c.bf16 %v214_v22, %v212_v21  ;;  %v216_v27 = vld [vmem:[%s507_s28 + $0x60] sm:$0xff] }
  0x15   : > { %415 = vmatprep.subr.bf16.mxu0 %v414_v14  ;;  %427 = vmatprep.subr.bf16.mxu1 %v414_v14  ;;  %v422_v26 = vpack.c.bf16 %v219_v24, %v217_v23  ;;  %v218_v28 = vld [vmem:[%s507_s28 + $0x70] sm:$0xff] }
  0x16   : > { %v424_v29 = vpack.c.bf16 %v218_v28, %v216_v27 }
  0x18   : > { %417 = vmatpush1.bf16.msra.mxu0 %v416_v19  ;;  %431 = vmatpush1.bf16.msra.mxu1 %v416_v19 }
  0x19   : > { %419 = vmatprep.subr.bf16.mxu0 %v418_v20  ;;  %428 = vmatprep.subr.bf16.mxu1 %v418_v20 }
  0x1c   : > { %421 = vmatpush1.bf16.msra.mxu0 %v420_v25  ;;  %432 = vmatpush1.bf16.msra.mxu1 %v420_v25 }
  0x1d   : > { %423 = vmatprep.subr.bf16.mxu0 %v422_v26  ;;  %429 = vmatprep.subr.bf16.mxu1 %v422_v26 }
  0x20   : > { %425 = vmatpush1.bf16.msra.mxu0 %v424_v29  ;;  %433 = vmatpush1.bf16.msra.mxu1 %v424_v29 }
  0x23   : > { %404 = vmatmul.mubr.msk.f32.vlgmr.msra.gmra.mrb[0].mxu0 %vm220_vm0, %v198_v30  ;;  %405 = vmatmul.mubr.msk.f32.vlgmr.msra.gmra.mrb[0].mxu1 %vm220_vm0, %v199_v31 }
  0x87   : > { %v307_v32 = vpop.permute.xlu0 %306  ;;  %v321_v33 = vpop.permute.xlu1 %320 }
  0x8b   : > { %v312_v34 = vpop.permute.xlu0 %311  ;;  %v326_v41 = vpop.permute.xlu1 %325 }
  0xf6   : > { %v293_v35 = vpop.f32.mrb[0].mxu0  ;;  %v299_v36 = vpop.f32.mrb[0].mxu1 }
  0xf7   : > { %v314_v37 = vmul.f32 %v307_v32, %v293_v35  ;;  %v316_v38 = vmul.f32 %v312_v34, %v299_v36  ;;  %v295_v39 = vpop.f32.mrb[1].mxu0  ;;  %v301_v40 = vpop.f32.mrb[1].mxu1 }
  0xf8   : > { %v315_v42 = vmul.f32 %v307_v32, %v295_v39  ;;  %v317_v43 = vmul.f32 %v312_v34, %v301_v40 }
  0xf9   : > { %v328_v44 = vadd.f32 %v321_v33, %v314_v37  ;;  %v330_v45 = vadd.f32 %v326_v41, %v316_v38 }
  0xfa   : > { %v329_v46 = vadd.f32 %v321_v33, %v315_v42  ;;  %v331_v47 = vadd.f32 %v326_v41, %v317_v43 }
  0xfb   : > { %v332_v48 = vmax.f32 %v328_v44, 0.0  ;;  %v334_v49 = vmax.f32 %v330_v45, 0.0 }
  0xfc   : > { %v333_v50 = vmax.f32 %v329_v46, 0.0  ;;  %v335_v51 = vmax.f32 %v331_v47, 0.0 }
  0xfd   : > { %336 = vst [vmem:[%s197_s10] sm:$0xff] %v332_v48  ;;  %338 = vst [vmem:[%s197_s10 + $0x10] sm:$0xff] %v334_v49 }
  0xfe   : > { %337 = vst [vmem:[%s197_s10 + $0x8] sm:$0xff] %v333_v50  ;;  %339 = vst [vmem:[%s197_s10 + $0x18] sm:$0xff] %v335_v51 }
  0xff PF: > { %s14_s15 = sadd.s32 1, %s452_s15  }
 0x100   : > { %p11_p4 = scmp.ge.s32.totalorder %s14_s15, 4  }
 0x102   :  { %13 = sbr.rel (!%p11_p4) target bundleno = 1 (0x1), region = 66 }

// kernel: bottleneck_forward.7
= control target key start
LH: loop header
LB: loop body
LE: loop exit
PB: predicated region body
PF: predicated region fallthrough
CT: control target
= control target key end

     0   :  { %s530_s15 = smov 0   ;;  %s613_s0 = inlined_call_operand.vmem [shape: f32[2,144,256], index: 0, kind: input, shape index: {}]   ;;  %s614_s1 = inlined_call_operand.vmem [shape: f32[16,144], index: 1, kind: input, shape index: {}]   ;;  %s615_s2 = inlined_call_operand.vmem [shape: f32[16,1], index: 2, kind: input, shape index: {}]   ;;  %s616_s3 = inlined_call_operand.vmem [shape: f32[16,1], index: 3, kind: input, shape index: {}]   ;;  %s617_s4 = inlined_call_operand.vmem [shape: f32[2,16,256], index: 4, kind: output, shape index: {}]  }
   0x1 LB: > { %s417_s16 = sadd.s32 4294967295, %s502_s15   ;;  %p421_p0 = scmp.ge.s32.totalorder %s502_s15, 1  ;;  %s502_s15 = sphi %s530_s15, %s14_s15  }
   0x2   : > { %p162_p1 = scmp.lt.s32.totalorder %s502_s15, 3 }
   0x4   : > { %p163_p2 = pnand %p421_p0, %p162_p1 }
   0x5   : > { %p188_p3 = scmp.lt.s32.totalorder (!%p163_p2), %s417_s16, 1  ;;  %v199_v0 = vld [vmem:[%s614_s1 + $0x8] sm:$0xff] (!%p163_p2)  ;;  %vm242_vm0 = vcmask (!%p163_p2), 130048   ;;  %v201_v1 = vld [vmem:[%s614_s1 + $0x18] sm:$0xff] (!%p163_p2)  ;;  %v202_v2 = vld [vmem:[%s615_s2] sm:$0xff] (!%p163_p2)  ;;  %v504_v4 = vmov (!%p163_p2), 0  }
   0x6   : > { %166 = sbr.rel (%p163_p2) target bundleno = 276 (0x114), region = 36  ;;  %425 = vmatprep.mubr.msk.f32.mxu0 (!%p163_p2), %vm242_vm0, %v199_v0  ;;  %426 = vmatprep.mubr.msk.f32.mxu1 (!%p163_p2), %vm242_vm0, %v201_v1  ;;  %v204_v3 = vld [vmem:[%s616_s3] sm:$0xff] (!%p163_p2)  ;;  %v203_v5 = vld [vmem:[%s615_s2 + $0x8] sm:$0xff] (!%p163_p2)  ;;  %v200_v62 = vld [vmem:[%s614_s1 + $0x10] sm:$0xff] (!%p163_p2) }
   0x7   : > { %494 = vset.pattern.permute.xlu0 (!%p163_p2), %v504_v4  ;;  %495 = vset.pattern.permute.xlu1 (!%p163_p2), %v504_v4  ;;  %v205_v6 = vld [vmem:[%s616_s3 + $0x8] sm:$0xff] (!%p163_p2)  ;;  %v198_v61 = vld [vmem:[%s614_s1] sm:$0xff] (!%p163_p2) }
   0x8   : > { %328 = vperm.xlu0 (!%p163_p2), %494, %v202_v2   ;;  %342 = vperm.xlu1 (!%p163_p2), %495, %v204_v3  }
   0xc   : > { %333 = vperm.xlu0 (!%p163_p2), %494, %v203_v5   ;;  %347 = vperm.xlu1 (!%p163_p2), %495, %v205_v6  }
   0xd   : > { %s619_s16 = smov (!%p188_p3, %s417_s16), 1 }
   0xe   : > { %s484_s25 = smul.u32 288, %s619_s16  ;;  %s429_s11 = sshll.u32 %s619_s16, 5 }
   0xf   : > { %s197_s14 = scalar_lea.vmem %s617_s4, %s429_s11 }
  0x10   : > { %s562_s6 = scalar_lea.vmem %s613_s0, %s484_s25 }
  0x11   : > { %v207_v7 = vld [vmem:[%s562_s6 + $0x8] sm:$0xff]  ;;  %v209_v8 = vld [vmem:[%s562_s6 + $0x18] sm:$0xff]  ;;  %v206_v9 = vld [vmem:[%s562_s6] sm:$0xff] }
  0x12   : > { %v430_v10 = vpack.c.bf16 %v209_v8, %v207_v7  ;;  %v208_v11 = vld [vmem:[%s562_s6 + $0x10] sm:$0xff]  ;;  %v211_v12 = vld [vmem:[%s562_s6 + $0x28] sm:$0xff]  ;;  %v213_v13 = vld [vmem:[%s562_s6 + $0x38] sm:$0xff] }
  0x13   : > { %v432_v14 = vpack.c.bf16 %v208_v11, %v206_v9  ;;  %v434_v15 = vpack.c.bf16 %v213_v13, %v211_v12  ;;  %v210_v16 = vld [vmem:[%s562_s6 + $0x20] sm:$0xff]  ;;  %v212_v17 = vld [vmem:[%s562_s6 + $0x30] sm:$0xff]  ;;  %v215_v18 = vld [vmem:[%s562_s6 + $0x48] sm:$0xff] }
  0x14   : > { %431 = vmatprep.subr.bf16.mxu0 %v430_v10  ;;  %466 = vmatprep.subr.bf16.mxu1 %v430_v10  ;;  %v217_v19 = vld [vmem:[%s562_s6 + $0x58] sm:$0xff]  ;;  %v436_v20 = vpack.c.bf16 %v212_v17, %v210_v16  ;;  %v214_v22 = vld [vmem:[%s562_s6 + $0x40] sm:$0xff]  ;;  %v216_v23 = vld [vmem:[%s562_s6 + $0x50] sm:$0xff] }
  0x15   : > { %433 = vmatpush1.bf16.msra.mxu0 %v432_v14  ;;  %475 = vmatpush1.bf16.msra.mxu1 %v432_v14  ;;  %v438_v21 = vpack.c.bf16 %v217_v19, %v215_v18  ;;  %v219_v24 = vld [vmem:[%s562_s6 + $0x68] sm:$0xff]  ;;  %v221_v25 = vld [vmem:[%s562_s6 + $0x78] sm:$0xff]  ;;  %v440_v26 = vpack.c.bf16 %v216_v23, %v214_v22  ;;  %v218_v28 = vld [vmem:[%s562_s6 + $0x60] sm:$0xff] }
  0x16   : > { %435 = vmatprep.subr.bf16.mxu0 %v434_v15  ;;  %467 = vmatprep.subr.bf16.mxu1 %v434_v15  ;;  %v442_v27 = vpack.c.bf16 %v221_v25, %v219_v24  ;;  %v220_v29 = vld [vmem:[%s562_s6 + $0x70] sm:$0xff]  ;;  %v223_v30 = vld [vmem:[%s562_s6 + $0x88] sm:$0xff]  ;;  %v225_v31 = vld [vmem:[%s562_s6 + $0x98] sm:$0xff] }
  0x17   : > { %v444_v32 = vpack.c.bf16 %v220_v29, %v218_v28  ;;  %v446_v33 = vpack.c.bf16 %v225_v31, %v223_v30  ;;  %v222_v34 = vld [vmem:[%s562_s6 + $0x80] sm:$0xff]  ;;  %v224_v35 = vld [vmem:[%s562_s6 + $0x90] sm:$0xff]  ;;  %v227_v36 = vld [vmem:[%s562_s6 + $0xa8] sm:$0xff] }
  0x18   : > { %v229_v37 = vld [vmem:[%s562_s6 + $0xb8] sm:$0xff]  ;;  %v448_v38 = vpack.c.bf16 %v224_v35, %v222_v34  ;;  %v226_v40 = vld [vmem:[%s562_s6 + $0xa0] sm:$0xff]  ;;  %v228_v41 = vld [vmem:[%s562_s6 + $0xb0] sm:$0xff] }
  0x19   : > { %437 = vmatpush1.bf16.msra.mxu0 %v436_v20  ;;  %476 = vmatpush1.bf16.msra.mxu1 %v436_v20  ;;  %v450_v39 = vpack.c.bf16 %v229_v37, %v227_v36  ;;  %v231_v42 = vld [vmem:[%s562_s6 + $0xc8] sm:$0xff]  ;;  %v233_v43 = vld [vmem:[%s562_s6 + $0xd8] sm:$0xff]  ;;  %v452_v44 = vpack.c.bf16 %v228_v41, %v226_v40  ;;  %v230_v46 = vld [vmem:[%s562_s6 + $0xc0] sm:$0xff] }
  0x1a   : > { %439 = vmatprep.subr.bf16.mxu0 %v438_v21  ;;  %468 = vmatprep.subr.bf16.mxu1 %v438_v21  ;;  %v454_v45 = vpack.c.bf16 %v233_v43, %v231_v42  ;;  %v232_v47 = vld [vmem:[%s562_s6 + $0xd0] sm:$0xff]  ;;  %v235_v48 = vld [vmem:[%s562_s6 + $0xe8] sm:$0xff]  ;;  %v237_v49 = vld [vmem:[%s562_s6 + $0xf8] sm:$0xff] }
  0x1b   : > { %v456_v50 = vpack.c.bf16 %v232_v47, %v230_v46  ;;  %v458_v51 = vpack.c.bf16 %v237_v49, %v235_v48  ;;  %v234_v52 = vld [vmem:[%s562_s6 + $0xe0] sm:$0xff]  ;;  %v236_v53 = vld [vmem:[%s562_s6 + $0xf0] sm:$0xff]  ;;  %v239_v54 = vld [vmem:[%s562_s6 + $0x108] sm:$0xff] }
  0x1c   : > { %v241_v55 = vld [vmem:[%s562_s6 + $0x118] sm:$0xff]  ;;  %v460_v56 = vpack.c.bf16 %v236_v53, %v234_v52  ;;  %v238_v58 = vld [vmem:[%s562_s6 + $0x100] sm:$0xff]  ;;  %v240_v59 = vld [vmem:[%s562_s6 + $0x110] sm:$0xff] }
  0x1d   : > { %441 = vmatpush1.bf16.msra.mxu0 %v440_v26  ;;  %477 = vmatpush1.bf16.msra.mxu1 %v440_v26  ;;  %v462_v57 = vpack.c.bf16 %v241_v55, %v239_v54  ;;  %v464_v60 = vpack.c.bf16 %v240_v59, %v238_v58 }
  0x1e   : > { %443 = vmatprep.subr.bf16.mxu0 %v442_v27  ;;  %469 = vmatprep.subr.bf16.mxu1 %v442_v27 }
  0x21   : > { %445 = vmatpush1.bf16.msra.mxu0 %v444_v32  ;;  %478 = vmatpush1.bf16.msra.mxu1 %v444_v32 }
  0x22   : > { %447 = vmatprep.subr.bf16.mxu0 %v446_v33  ;;  %470 = vmatprep.subr.bf16.mxu1 %v446_v33 }
  0x25   : > { %449 = vmatpush1.bf16.msra.mxu0 %v448_v38  ;;  %479 = vmatpush1.bf16.msra.mxu1 %v448_v38 }
  0x26   : > { %451 = vmatprep.subr.bf16.mxu0 %v450_v39  ;;  %471 = vmatprep.subr.bf16.mxu1 %v450_v39 }
  0x29   : > { %453 = vmatpush1.bf16.msra.mxu0 %v452_v44  ;;  %480 = vmatpush1.bf16.msra.mxu1 %v452_v44 }
  0x2a   : > { %455 = vmatprep.subr.bf16.mxu0 %v454_v45  ;;  %472 = vmatprep.subr.bf16.mxu1 %v454_v45 }
  0x2d   : > { %457 = vmatpush1.bf16.msra.mxu0 %v456_v50  ;;  %481 = vmatpush1.bf16.msra.mxu1 %v456_v50 }
  0x2e   : > { %459 = vmatprep.subr.bf16.mxu0 %v458_v51  ;;  %473 = vmatprep.subr.bf16.mxu1 %v458_v51 }
  0x31   : > { %461 = vmatpush1.bf16.msra.mxu0 %v460_v56  ;;  %482 = vmatpush1.bf16.msra.mxu1 %v460_v56 }
  0x32   : > { %463 = vmatprep.subr.bf16.mxu0 %v462_v57  ;;  %474 = vmatprep.subr.bf16.mxu1 %v462_v57 }
  0x35   : > { %465 = vmatpush1.bf16.msra.mxu0 %v464_v60  ;;  %483 = vmatpush1.bf16.msra.mxu1 %v464_v60 }
  0x38   : > { %314 = vmatmul.mubr.f32.vlgmr.msra.gmra.mrb[0].mxu0 %v198_v61  ;;  %320 = vmatmul.mubr.f32.vlgmr.msra.gmra.mrb[0].mxu1 %v200_v62 }
  0x87   : > { %v329_v63 = vpop.permute.xlu0 %328  ;;  %v343_v0 = vpop.permute.xlu1 %342 }
  0x8b   : > { %v334_v1 = vpop.permute.xlu0 %333  ;;  %v348_v8 = vpop.permute.xlu1 %347 }
 0x10b   : > { %v315_v2 = vpop.f32.mrb[0].mxu0  ;;  %v321_v3 = vpop.f32.mrb[0].mxu1 }
 0x10c   : > { %v336_v4 = vmul.f32 %v329_v63, %v315_v2  ;;  %v338_v5 = vmul.f32 %v334_v1, %v321_v3  ;;  %v317_v6 = vpop.f32.mrb[1].mxu0  ;;  %v323_v7 = vpop.f32.mrb[1].mxu1 }
 0x10d   : > { %v337_v9 = vmul.f32 %v329_v63, %v317_v6  ;;  %v339_v10 = vmul.f32 %v334_v1, %v323_v7 }
 0x10e   : > { %v350_v11 = vadd.f32 %v343_v0, %v336_v4  ;;  %v352_v12 = vadd.f32 %v348_v8, %v338_v5 }
 0x10f   : > { %v351_v13 = vadd.f32 %v343_v0, %v337_v9  ;;  %v353_v14 = vadd.f32 %v348_v8, %v339_v10 }
 0x110   : > { %v354_v15 = vmax.f32 %v350_v11, 0.0  ;;  %v356_v16 = vmax.f32 %v352_v12, 0.0 }
 0x111   : > { %v355_v17 = vmax.f32 %v351_v13, 0.0  ;;  %v357_v18 = vmax.f32 %v353_v14, 0.0 }
 0x112   : > { %358 = vst [vmem:[%s197_s14] sm:$0xff] %v354_v15  ;;  %360 = vst [vmem:[%s197_s14 + $0x10] sm:$0xff] %v356_v16 }
 0x113   : > { %359 = vst [vmem:[%s197_s14 + $0x8] sm:$0xff] %v355_v17  ;;  %361 = vst [vmem:[%s197_s14 + $0x18] sm:$0xff] %v357_v18 }
 0x114 PF: > { %s14_s15 = sadd.s32 1, %s502_s15  }
 0x115   : > { %p11_p4 = scmp.ge.s32.totalorder %s14_s15, 4  }
 0x117   :  { %13 = sbr.rel (!%p11_p4) target bundleno = 1 (0x1), region = 66 }

// kernel: bottleneck_forward.8
= control target key start
LH: loop header
LB: loop body
LE: loop exit
PB: predicated region body
PF: predicated region fallthrough
CT: control target
= control target key end

     0   :  { %s621_s15 = smov 0   ;;  %s752_s0 = inlined_call_operand.vmem [shape: f32[2,16,256], index: 0, kind: input, shape index: {}]   ;;  %s753_s1 = inlined_call_operand.vmem [shape: f32[64,16], index: 1, kind: input, shape index: {}]   ;;  %s754_s2 = inlined_call_operand.vmem [shape: f32[64,1], index: 2, kind: input, shape index: {}]   ;;  %s755_s3 = inlined_call_operand.vmem [shape: f32[64,1], index: 3, kind: input, shape index: {}]   ;;  %s756_s4 = inlined_call_operand.vmem [shape: f32[2,64,256], index: 4, kind: output, shape index: {}]  }
   0x1 LB: > { %s547_s16 = sadd.s32 4294967295, %s592_s15   ;;  %p551_p0 = scmp.ge.s32.totalorder %s592_s15, 1  ;;  %s592_s15 = sphi %s621_s15, %s14_s15  }
   0x2   : > { %p162_p1 = scmp.lt.s32.totalorder %s592_s15, 3 }
   0x4   : > { %p163_p2 = pnand %p551_p0, %p162_p1 }
   0x5   : > { %p188_p3 = scmp.lt.s32.totalorder (!%p163_p2), %s547_s16, 1  ;;  %v594_v0 = vmov (!%p163_p2), 0.0   ;;  %v595_v1 = vmov (!%p163_p2), 0   ;;  %v208_v2 = vld [vmem:[%s754_s2 + $0x10] sm:$0xff] (!%p163_p2)  ;;  %v206_v3 = vld [vmem:[%s754_s2] sm:$0xff] (!%p163_p2)  ;;  %v209_v4 = vld [vmem:[%s754_s2 + $0x18] sm:$0xff] (!%p163_p2) }
   0x6   : > { %166 = sbr.rel (%p163_p2) target bundleno = 253 (0xfd), region = 36  ;;  %315 = vmatprep.mubr.f32.mxu0 (!%p163_p2), %v594_v0  ;;  %339 = vmatprep.mubr.f32.mxu1 (!%p163_p2), %v594_v0  ;;  %v207_v5 = vld [vmem:[%s754_s2 + $0x8] sm:$0xff] (!%p163_p2)  ;;  %v210_v13 = vld [vmem:[%s754_s2 + $0x20] sm:$0xff] (!%p163_p2)  ;;  %vm226_vm0 = vcmask (!%p163_p2), 130048   ;;  %v213_v16 = vld [vmem:[%s754_s2 + $0x38] sm:$0xff] (!%p163_p2) }
   0x7   : > { %585 = vset.pattern.permute.xlu1 (!%p163_p2), %v595_v1  ;;  %584 = vset.pattern.permute.xlu0 (!%p163_p2), %v595_v1  ;;  %v211_v12 = vld [vmem:[%s754_s2 + $0x28] sm:$0xff] (!%p163_p2)  ;;  %v198_v14 = vld [vmem:[%s753_s1] sm:$0xff] (!%p163_p2)  ;;  %v212_v17 = vld [vmem:[%s754_s2 + $0x30] sm:$0xff] (!%p163_p2) }
   0x8   : > { %376 = vperm.xlu1 (!%p163_p2), %585, %v208_v2   ;;  %366 = vperm.xlu0 (!%p163_p2), %584, %v206_v3   ;;  %v202_v15 = vld [vmem:[%s753_s1 + $0x20] sm:$0xff] (!%p163_p2)  ;;  %v199_v18 = vld [vmem:[%s753_s1 + $0x8] sm:$0xff] (!%p163_p2)  ;;  %v200_v22 = vld [vmem:[%s753_s1 + $0x10] sm:$0xff] (!%p163_p2) }
   0x9   : > { %v203_v19 = vld [vmem:[%s753_s1 + $0x28] sm:$0xff] (!%p163_p2)  ;;  %v214_v21 = vld [vmem:[%s755_s3] sm:$0xff] (!%p163_p2)  ;;  %v204_v23 = vld [vmem:[%s753_s1 + $0x30] sm:$0xff] (!%p163_p2) }
   0xa   : > { %v215_v20 = vld [vmem:[%s755_s3 + $0x8] sm:$0xff] (!%p163_p2)  ;;  %v217_v24 = vld [vmem:[%s755_s3 + $0x18] sm:$0xff] (!%p163_p2)  ;;  %v216_v25 = vld [vmem:[%s755_s3 + $0x10] sm:$0xff] (!%p163_p2) }
   0xb   : > { %v201_v26 = vld [vmem:[%s753_s1 + $0x18] sm:$0xff] (!%p163_p2)  ;;  %v219_v28 = vld [vmem:[%s755_s3 + $0x28] sm:$0xff] (!%p163_p2)  ;;  %v218_v29 = vld [vmem:[%s755_s3 + $0x20] sm:$0xff] (!%p163_p2) }
   0xc   : > { %381 = vperm.xlu1 (!%p163_p2), %585, %v209_v4   ;;  %371 = vperm.xlu0 (!%p163_p2), %584, %v207_v5   ;;  %v205_v27 = vld [vmem:[%s753_s1 + $0x38] sm:$0xff] (!%p163_p2)  ;;  %v220_v31 = vld [vmem:[%s755_s3 + $0x30] sm:$0xff] (!%p163_p2) }
   0xd   : > { %s758_s16 = smov (!%p188_p3, %s547_s16), 1  ;;  %v221_v30 = vld [vmem:[%s755_s3 + $0x38] sm:$0xff] }
   0xe   : > { %s566_s21 = sshll.u32 %s758_s16, 5 }
   0xf   : > { %s192_s26 = scalar_lea.vmem %s752_s0, %s566_s21  ;;  %s567_s21 = sshll.u32 %s758_s16, 7 }
  0x10   : > { %v223_v6 = vld [vmem:[%s192_s26 + $0x8] sm:$0xff]  ;;  %v225_v7 = vld [vmem:[%s192_s26 + $0x18] sm:$0xff]  ;;  %v222_v8 = vld [vmem:[%s192_s26] sm:$0xff]  ;;  %391 = vperm.xlu1 %585, %v211_v12   ;;  %386 = vperm.xlu0 %584, %v210_v13   ;;  %s725_s24 = scalar_lea.vmem %s756_s4, %s567_s21 }
  0x11   : > { %v568_v9 = vpack.c.bf16 %v225_v7, %v223_v6  ;;  %v224_v10 = vld [vmem:[%s192_s26 + $0x10] sm:$0xff] }
  0x12   : > { %v570_v11 = vpack.c.bf16 %v224_v10, %v222_v8 }
  0x13   : > { %569 = vmatprep.subr.bf16.mxu0 %v568_v9  ;;  %572 = vmatprep.subr.bf16.mxu1 %v568_v9 }
  0x14   : > { %571 = vmatpush1.bf16.msra.mxu0 %v570_v11  ;;  %573 = vmatpush1.bf16.msra.mxu1 %v570_v11 }
  0x15   : > { %401 = vperm.xlu1 %585, %v213_v16   ;;  %396 = vperm.xlu0 %584, %v212_v17  }
  0x17   : > { %556 = vmatmul.mubr.msk.f32.vlgmr.msra.gmra.mrb[0].mxu0 %vm226_vm0, %v198_v14  ;;  %560 = vmatmul.mubr.msk.f32.vlgmr.msra.gmra.mrb[0].mxu1 %vm226_vm0, %v202_v15 }
  0x18   : > { %321 = vmatprep.mubr.f32.mxu0 %v594_v0  ;;  %345 = vmatprep.mubr.f32.mxu1 %v594_v0 }
  0x19   : > { %427 = vperm.xlu1 %585, %v215_v20   ;;  %422 = vperm.xlu0 %584, %v214_v21  }
  0x1b   : > { %557 = vmatmul.mubr.msk.f32.gmra.mrb[2].mxu0 %vm226_vm0, %v199_v18  ;;  %561 = vmatmul.mubr.msk.f32.gmra.mrb[2].mxu1 %vm226_vm0, %v203_v19 }
  0x1c   : > { %327 = vmatprep.mubr.f32.mxu0 %v594_v0  ;;  %351 = vmatprep.mubr.f32.mxu1 %v594_v0 }
  0x1d   : > { %437 = vperm.xlu1 %585, %v217_v24   ;;  %432 = vperm.xlu0 %584, %v216_v25  }
  0x1f   : > { %558 = vmatmul.mubr.msk.f32.gmra.mrb[4].mxu0 %vm226_vm0, %v200_v22  ;;  %562 = vmatmul.mubr.msk.f32.gmra.mrb[4].mxu1 %vm226_vm0, %v204_v23 }
  0x20   : > { %333 = vmatprep.mubr.f32.mxu0 %v594_v0  ;;  %357 = vmatprep.mubr.f32.mxu1 %v594_v0 }
  0x21   : > { %447 = vperm.xlu1 %585, %v219_v28   ;;  %442 = vperm.xlu0 %584, %v218_v29  }
  0x23   : > { %559 = vmatmul.mubr.msk.f32.gmra.mrb[6].mxu0 %vm226_vm0, %v201_v26  ;;  %563 = vmatmul.mubr.msk.f32.gmra.mrb[6].mxu1 %vm226_vm0, %v205_v27 }
  0x25   : > { %457 = vperm.xlu1 %585, %v221_v30   ;;  %452 = vperm.xlu0 %584, %v220_v31  }
  0x87   : > { %v367_v32 = vpop.permute.xlu0 %366  ;;  %v377_v33 = vpop.permute.xlu1 %376 }
  0x8b   : > { %v372_v34 = vpop.permute.xlu0 %371  ;;  %v715_v35 = vpop.permute.xlu1 %381 }
  0x8f   : > { %v387_v36 = vpop.permute.xlu0 %386  ;;  %v392_v37 = vpop.permute.xlu1 %391 }
  0x94   : > { %v397_v38 = vpop.permute.xlu0 %396  ;;  %v717_v39 = vpop.permute.xlu1 %401 }
  0x98   : > { %v423_v40 = vpop.permute.xlu0 %422  ;;  %v428_v41 = vpop.permute.xlu1 %427 }
  0x9c   : > { %v433_v42 = vpop.permute.xlu0 %432  ;;  %v720_v43 = vpop.permute.xlu1 %437 }
  0xa0   : > { %v443_v50 = vpop.permute.xlu0 %442  ;;  %v448_v63 = vpop.permute.xlu1 %447 }
  0xa4   : > { %v453_v12 = vpop.permute.xlu0 %452  ;;  %v458_v25 = vpop.permute.xlu1 %457 }
  0xea   : > { %v317_v44 = vpop.f32.mrb[0].mxu0  ;;  %v341_v45 = vpop.f32.mrb[0].mxu1 }
  0xeb   : > { %v404_v46 = vmul.f32 %v367_v32, %v317_v44  ;;  %v412_v47 = vmul.f32 %v387_v36, %v341_v45  ;;  %v319_v48 = vpop.f32.mrb[1].mxu0  ;;  %v343_v49 = vpop.f32.mrb[1].mxu1 }
  0xec   : > { %v405_v51 = vmul.f32 %v367_v32, %v319_v48  ;;  %v413_v52 = vmul.f32 %v387_v36, %v343_v49 }
  0xed   : > { %v460_v53 = vadd.f32 %v423_v40, %v404_v46  ;;  %v468_v54 = vadd.f32 %v443_v50, %v412_v47 }
  0xee   : > { %v461_v55 = vadd.f32 %v423_v40, %v405_v51  ;;  %v469_v56 = vadd.f32 %v443_v50, %v413_v52  ;;  %v323_v57 = vpop.f32.mrb[2].mxu0  ;;  %v347_v58 = vpop.f32.mrb[2].mxu1 }
  0xef   : > { %476 = vst [vmem:[%s725_s24] sm:$0xff] %v460_v53  ;;  %484 = vst [vmem:[%s725_s24 + $0x40] sm:$0xff] %v468_v54  ;;  %v406_v59 = vmul.f32 %v372_v34, %v323_v57  ;;  %v414_v60 = vmul.f32 %v392_v37, %v347_v58  ;;  %v325_v61 = vpop.f32.mrb[3].mxu0  ;;  %v349_v62 = vpop.f32.mrb[3].mxu1 }
  0xf0   : > { %477 = vst [vmem:[%s725_s24 + $0x8] sm:$0xff] %v461_v55  ;;  %485 = vst [vmem:[%s725_s24 + $0x48] sm:$0xff] %v469_v56  ;;  %v407_v0 = vmul.f32 %v372_v34, %v325_v61  ;;  %v415_v1 = vmul.f32 %v392_v37, %v349_v62 }
  0xf1   : > { %v462_v2 = vadd.f32 %v428_v41, %v406_v59  ;;  %v470_v3 = vadd.f32 %v448_v63, %v414_v60 }
  0xf2   : > { %v463_v4 = vadd.f32 %v428_v41, %v407_v0  ;;  %v471_v5 = vadd.f32 %v448_v63, %v415_v1  ;;  %v329_v6 = vpop.f32.mrb[4].mxu0  ;;  %v353_v7 = vpop.f32.mrb[4].mxu1 }
  0xf3   : > { %478 = vst [vmem:[%s725_s24 + $0x10] sm:$0xff] %v462_v2  ;;  %486 = vst [vmem:[%s725_s24 + $0x50] sm:$0xff] %v470_v3  ;;  %v408_v8 = vmul.f32 %v377_v33, %v329_v6  ;;  %v416_v9 = vmul.f32 %v397_v38, %v353_v7  ;;  %v331_v10 = vpop.f32.mrb[5].mxu0  ;;  %v355_v11 = vpop.f32.mrb[5].mxu1 }
  0xf4   : > { %479 = vst [vmem:[%s725_s24 + $0x18] sm:$0xff] %v463_v4  ;;  %487 = vst [vmem:[%s725_s24 + $0x58] sm:$0xff] %v471_v5  ;;  %v409_v13 = vmul.f32 %v377_v33, %v331_v10  ;;  %v417_v14 = vmul.f32 %v397_v38, %v355_v11 }
  0xf5   : > { %v464_v15 = vadd.f32 %v433_v42, %v408_v8  ;;  %v472_v16 = vadd.f32 %v453_v12, %v416_v9 }
  0xf6   : > { %v465_v17 = vadd.f32 %v433_v42, %v409_v13  ;;  %v473_v18 = vadd.f32 %v453_v12, %v417_v14  ;;  %v335_v19 = vpop.f32.mrb[6].mxu0  ;;  %v359_v20 = vpop.f32.mrb[6].mxu1 }
  0xf7   : > { %480 = vst [vmem:[%s725_s24 + $0x20] sm:$0xff] %v464_v15  ;;  %488 = vst [vmem:[%s725_s24 + $0x60] sm:$0xff] %v472_v16  ;;  %v410_v21 = vmul.f32 %v715_v35, %v335_v19  ;;  %v418_v22 = vmul.f32 %v717_v39, %v359_v20  ;;  %v337_v23 = vpop.f32.mrb[7].mxu0  ;;  %v361_v24 = vpop.f32.mrb[7].mxu1 }
  0xf8   : > { %481 = vst [vmem:[%s725_s24 + $0x28] sm:$0xff] %v465_v17  ;;  %489 = vst [vmem:[%s725_s24 + $0x68] sm:$0xff] %v473_v18  ;;  %v411_v26 = vmul.f32 %v715_v35, %v337_v23  ;;  %v419_v27 = vmul.f32 %v717_v39, %v361_v24 }
  0xf9   : > { %v466_v28 = vadd.f32 %v720_v43, %v410_v21  ;;  %v474_v29 = vadd.f32 %v458_v25, %v418_v22 }
  0xfa   : > { %v467_v30 = vadd.f32 %v720_v43, %v411_v26  ;;  %v475_v31 = vadd.f32 %v458_v25, %v419_v27 }
  0xfb   : > { %482 = vst [vmem:[%s725_s24 + $0x30] sm:$0xff] %v466_v28  ;;  %490 = vst [vmem:[%s725_s24 + $0x70] sm:$0xff] %v474_v29 }
  0xfc   : > { %483 = vst [vmem:[%s725_s24 + $0x38] sm:$0xff] %v467_v30  ;;  %491 = vst [vmem:[%s725_s24 + $0x78] sm:$0xff] %v475_v31 }
  0xfd PF: > { %s14_s15 = sadd.s32 1, %s592_s15  }
  0xfe   : > { %p11_p4 = scmp.ge.s32.totalorder %s14_s15, 4  }
 0x100   :  { %13 = sbr.rel (!%p11_p4) target bundleno = 1 (0x1), region = 66 }

// kernel: bottleneck_forward.9
= control target key start
LH: loop header
LB: loop body
LE: loop exit
PB: predicated region body
PF: predicated region fallthrough
CT: control target
= control target key end

     0   :  { %s1128_s21 = smov 0   ;;  %s1342_s0 = inlined_call_operand.vmem [shape: f32[2,64,256], index: 0, kind: input, shape index: {}]   ;;  %s1343_s1 = inlined_call_operand.vmem [shape: f32[4,64], index: 1, kind: input, shape index: {}]   ;;  %s1344_s2 = inlined_call_operand.vmem [shape: f32[4,1], index: 2, kind: input, shape index: {}]   ;;  %s1345_s3 = inlined_call_operand.vmem [shape: f32[64,4], index: 3, kind: input, shape index: {}]   ;;  %s1346_s4 = inlined_call_operand.vmem [shape: f32[64,1], index: 4, kind: input, shape index: {}]   ;;  %s1347_s5 = inlined_call_operand.vmem [shape: f32[2,64,256], index: 5, kind: output, shape index: {0}]   ;;  %s1348_s6 = inlined_call_operand.vmem [shape: f32[2,2,256], index: 6, kind: output, shape index: {1}]  }
   0x1 LB: > { %s935_s22 = sadd.s32 4294967295, %s1086_s21   ;;  %p939_p0 = scmp.ge.s32.totalorder %s1086_s21, 1  ;;  %s1086_s21 = sphi %s1128_s21, %s17_s21  }
   0x2   : > { %p215_p1 = scmp.lt.s32.totalorder %s1086_s21, 3 }
   0x4   : > { %p216_p2 = pnand %p939_p0, %p215_p1 }
   0x5   : > { %p250_p3 = scmp.lt.s32.totalorder (!%p216_p2), %s935_s22, 1  ;;  %v1088_v30 = vmov (!%p216_p2), 0.0|0.0   ;;  %vm1089_vm0 = vmmov (!%p216_p2), 0   ;;  %v1090_v33 = vmov (!%p216_p2), 0.0   ;;  %v266_v34 = vld [vmem:[%s1344_s2] sm:$0xf] (!%p216_p2) }
   0x6   : > { %219 = sbr.rel (%p216_p2) target bundleno = 938 (0x3aa), region = 40  ;;  %1021 = vmatprep.subr.bf16.mxu0 (!%p216_p2), %v1088_v30  ;;  %1004 = vmatprep.mubr.msk.f32.mxu0 (!%p216_p2), %vm1089_vm0, %v1090_v33  ;;  %v1091_v35 = vmov (!%p216_p2), 0   ;;  %vm355_vm1 = vcmask (!%p216_p2), 7168   ;;  %vm369_vm2 = vcmask (!%p216_p2), 523264   ;;  %vm484_vm3 = vcmask (!%p216_p2), 31744   ;;  %v282_v33 = vld [vmem:[%s1346_s4 + $0x38] sm:$0xff] (!%p216_p2) }
   0x7   : > { %1046 = vset.pattern.permute.xlu0 (!%p216_p2), %v1091_v35  ;;  %1047 = vset.pattern.permute.xlu1 (!%p216_p2), %v1091_v35  ;;  %vm509_vm4 = vcmask (!%p216_p2), 1043456   ;;  %s1092_s18 = smov (!%p216_p2), 127   ;;  %vm832_vm5 = vcmask (!%p216_p2), 1040384  }
   0xd   : > { %s1350_s22 = smov (!%p250_p3, %s935_s22), 1 }
   0xe   : > { %s967_s23 = sshll.u32 %s1350_s22, 7 }
   0xf   : > { %s1144_s26 = scalar_lea.vmem %s1342_s0, %s967_s23  ;;  %s1301_s24 = scalar_lea.vmem %s1347_s5, %s967_s23 }
  0x10   : > { %v1147_v0 = vld [vmem:[%s1144_s26] sm:$0xff]  ;;  %v1150_v1 = vld [vmem:[%s1144_s26 + $0x8] sm:$0xff]  ;;  %v1153_v2 = vld [vmem:[%s1144_s26 + $0x10] sm:$0xff]  ;;  %s969_s23 = sshll.u32 %s1350_s22, 2 }
  0x11   : > { %v331_v3 = vmax.f32 %v1147_v0, %v1150_v1  ;;  %v299_v4 = vadd.f32 %v1150_v1, %v1147_v0  ;;  %v1160_v5 = vld [vmem:[%s1144_s26 + $0x18] sm:$0xff]  ;;  %v1167_v8 = vld [vmem:[%s1144_s26 + $0x30] sm:$0xff]  ;;  %v1173_v10 = vld [vmem:[%s1144_s26 + $0x20] sm:$0xff]  ;;  %s264_s27 = scalar_lea.vmem %s1348_s6, %s969_s23 }
  0x12   : > { %v334_v6 = vmax.f32 %v1153_v2, %v1160_v5  ;;  %v302_v7 = vadd.f32 %v1160_v5, %v1153_v2  ;;  %v1170_v9 = vld [vmem:[%s1144_s26 + $0x38] sm:$0xff]  ;;  %v1176_v11 = vld [vmem:[%s1144_s26 + $0x28] sm:$0xff]  ;;  %v1187_v16 = vld [vmem:[%s1144_s26 + $0x50] sm:$0xff] }
  0x13   : > { %332 = vmax.xlane.f32.xlu1 %v331_v3  ;;  %300 = vadd.xlane.f32.xlu0 %v299_v4  ;;  %v308_v12 = vadd.f32 %v1170_v9, %v1167_v8  ;;  %v305_v13 = vadd.f32 %v1176_v11, %v1173_v10  ;;  %v340_v14 = vmax.f32 %v1167_v8, %v1170_v9  ;;  %v1190_v17 = vld [vmem:[%s1144_s26 + $0x58] sm:$0xff]  ;;  %v1193_v18 = vld [vmem:[%s1144_s26 + $0x40] sm:$0xff]  ;;  %v1196_v19 = vld [vmem:[%s1144_s26 + $0x48] sm:$0xff] }
  0x14   : > { %v337_v15 = vmax.f32 %v1173_v10, %v1176_v11  ;;  %v314_v20 = vadd.f32 %v1190_v17, %v1187_v16  ;;  %v311_v21 = vadd.f32 %v1196_v19, %v1193_v18  ;;  %v346_v22 = vmax.f32 %v1187_v16, %v1190_v17  ;;  %v1207_v24 = vld [vmem:[%s1144_s26 + $0x70] sm:$0xff]  ;;  %v1210_v25 = vld [vmem:[%s1144_s26 + $0x78] sm:$0xff]  ;;  %v1213_v26 = vld [vmem:[%s1144_s26 + $0x60] sm:$0xff] }
  0x15   : > { %v343_v23 = vmax.f32 %v1193_v18, %v1196_v19  ;;  %v1216_v27 = vld [vmem:[%s1144_s26 + $0x68] sm:$0xff]  ;;  %v320_v28 = vadd.f32 %v1210_v25, %v1207_v24  ;;  %v352_v31 = vmax.f32 %v1207_v24, %v1210_v25 }
  0x16   : > { %v317_v29 = vadd.f32 %v1216_v27, %v1213_v26  ;;  %v349_v32 = vmax.f32 %v1213_v26, %v1216_v27 }
  0x17   : > { %335 = vmax.xlane.f32.xlu1 %v334_v6  ;;  %303 = vadd.xlane.f32.xlu0 %v302_v7 }
  0x1b   : > { %309 = vadd.xlane.f32.xlu1 %v308_v12  ;;  %306 = vadd.xlane.f32.xlu0 %v305_v13 }
  0x1f   : > { %341 = vmax.xlane.f32.xlu1 %v340_v14  ;;  %338 = vmax.xlane.f32.xlu0 %v337_v15 }
  0x23   : > { %315 = vadd.xlane.f32.xlu1 %v314_v20  ;;  %312 = vadd.xlane.f32.xlu0 %v311_v21  ;;  %v265_v20 = vld [vmem:[%s1343_s1] sm:$0xf] }
  0x24   : > { %v267_v21 = vld [vmem:[%s1345_s3] sm:$0xff] }
  0x25   : > { %1009 = vmatprep.mubr.msk.f32.mxu1 %vm484_vm3, %v267_v21 }
  0x27   : > { %347 = vmax.xlane.f32.xlu1 %v346_v22  ;;  %344 = vmax.xlane.f32.xlu0 %v343_v23  ;;  %v275_v22 = vld [vmem:[%s1346_s4] sm:$0xff]  ;;  %v276_v23 = vld [vmem:[%s1346_s4 + $0x8] sm:$0xff] }
  0x2b   : > { %321 = vadd.xlane.f32.xlu1 %v320_v28  ;;  %318 = vadd.xlane.f32.xlu0 %v317_v29  ;;  %v277_v28 = vld [vmem:[%s1346_s4 + $0x10] sm:$0xff]  ;;  %v278_v29 = vld [vmem:[%s1346_s4 + $0x18] sm:$0xff] }
  0x2f   : > { %353 = vmax.xlane.f32.xlu1 %v352_v31  ;;  %350 = vmax.xlane.f32.xlu0 %v349_v32  ;;  %v280_v31 = vld [vmem:[%s1346_s4 + $0x28] sm:$0xff]  ;;  %v281_v32 = vld [vmem:[%s1346_s4 + $0x30] sm:$0xff] }
  0x40   : > { %446 = vperm.xlu1 %1047, %v275_v22  }
  0x44   : > { %451 = vperm.xlu1 %1047, %v276_v23  }
  0x45   : > { %366 = vperm.xlu0 %1046, %v266_v34  }
  0x48   : > { %456 = vperm.xlu1 %1047, %v277_v28  }
  0x4c   : > { %461 = vperm.xlu1 %1047, %v278_v29  }
  0xa0   : > { %v333_v36 = vpop.xlane.xlu1 %332  ;;  %v301_v37 = vpop.xlane.xlu0 %300 }
  0xa1   : > { %v323_v38 = vmul.f32 0.00390625, %v301_v37 }
  0xa3   : > { %v356_v42 = vsel %vm355_vm1, %v323_v38, %v333_v36 }
  0xa4   : > { %v336_v39 = vpop.xlane.xlu1 %335  ;;  %v304_v40 = vpop.xlane.xlu0 %303 }
  0xa5   : > { %v324_v41 = vmul.f32 0.00390625, %v304_v40  ;;  %v269_v40 = vld [vmem:[%s1345_s3 + $0x10] sm:$0xff] }
  0xa7   : > { %v357_v43 = vsel %vm355_vm1, %v324_v41, %v336_v39  ;;  %v268_v39 = vld [vmem:[%s1345_s3 + $0x8] sm:$0xff]  ;;  %v270_v41 = vld [vmem:[%s1345_s3 + $0x18] sm:$0xff] }
  0xa8   : > { %v310_v44 = vpop.xlane.xlu1 %309  ;;  %v307_v45 = vpop.xlane.xlu0 %306  ;;  %v1022_v46 = vpack.c.bf16 %v357_v43, %v356_v42  ;;  %v271_v42 = vld [vmem:[%s1345_s3 + $0x20] sm:$0xff]  ;;  %v272_v43 = vld [vmem:[%s1345_s3 + $0x28] sm:$0xff] }
  0xa9   : > { %v326_v47 = vmul.f32 0.00390625, %v310_v44  ;;  %v325_v48 = vmul.f32 0.00390625, %v307_v45  ;;  %v273_v44 = vld [vmem:[%s1345_s3 + $0x30] sm:$0xff]  ;;  %v274_v45 = vld [vmem:[%s1345_s3 + $0x38] sm:$0xff] }
  0xaa   : > { %1023 = vmatpush3.bf16.msra.mxu0 %v1022_v46 }
  0xab   : > { %1024 = vmatprep.subr.bf16.mxu0 %v1088_v30 }
  0xac   : > { %v342_v49 = vpop.xlane.xlu1 %341  ;;  %v339_v50 = vpop.xlane.xlu0 %338 }
  0xad   : > { %v359_v51 = vsel %vm355_vm1, %v326_v47, %v342_v49  ;;  %v358_v52 = vsel %vm355_vm1, %v325_v48, %v339_v50 }
  0xae   : > { %v1025_v53 = vpack.c.bf16 %v359_v51, %v358_v52 }
  0xb0   : > { %v316_v54 = vpop.xlane.xlu1 %315  ;;  %1026 = vmatpush3.bf16.msra.mxu0 %v1025_v53  ;;  %v313_v55 = vpop.xlane.xlu0 %312 }
  0xb1   : > { %1027 = vmatprep.subr.bf16.mxu0 %v1088_v30  ;;  %v328_v56 = vmul.f32 0.00390625, %v316_v54  ;;  %v327_v57 = vmul.f32 0.00390625, %v313_v55 }
  0xb4   : > { %v348_v58 = vpop.xlane.xlu1 %347  ;;  %v345_v59 = vpop.xlane.xlu0 %344 }
  0xb5   : > { %v361_v60 = vsel %vm355_vm1, %v328_v56, %v348_v58  ;;  %v360_v61 = vsel %vm355_vm1, %v327_v57, %v345_v59 }
  0xb6   : > { %v1028_v62 = vpack.c.bf16 %v361_v60, %v360_v61 }
  0xb8   : > { %v322_v63 = vpop.xlane.xlu1 %321  ;;  %1029 = vmatpush3.bf16.msra.mxu0 %v1028_v62  ;;  %v319_v3 = vpop.xlane.xlu0 %318 }
  0xb9   : > { %1030 = vmatprep.subr.bf16.mxu0 %v1088_v30  ;;  %v330_v4 = vmul.f32 0.00390625, %v322_v63  ;;  %v329_v6 = vmul.f32 0.00390625, %v319_v3  ;;  %v279_v30 = vld [vmem:[%s1346_s4 + $0x20] sm:$0xff] }
  0xba   : > { %466 = vperm.xlu1 %1047, %v279_v30  }
  0xbc   : > { %v354_v7 = vpop.xlane.xlu1 %353  ;;  %v351_v12 = vpop.xlane.xlu0 %350 }
  0xbd   : > { %v363_v13 = vsel %vm355_vm1, %v330_v4, %v354_v7  ;;  %v362_v14 = vsel %vm355_vm1, %v329_v6, %v351_v12 }
  0xbe   : > { %v1031_v15 = vpack.c.bf16 %v363_v13, %v362_v14  ;;  %471 = vperm.xlu1 %1047, %v280_v31  }
  0xc0   : > { %1032 = vmatpush3.bf16.msra.mxu0 %v1031_v15  ;;  %v447_v46 = vpop.permute.xlu1 %446 }
  0xc2   : > { %476 = vperm.xlu1 %1047, %v281_v32  }
  0xc3   : > { %1005 = vmatmul.mubr.msk.f32.vlgmr.msra.gmra.mrb[0].mxu0 %vm369_vm2, %v265_v20 }
  0xc4   : > { %v367_v34 = vpop.permute.xlu0 %366  ;;  %v452_v47 = vpop.permute.xlu1 %451 }
  0xc6   : > { %481 = vperm.xlu1 %1047, %v282_v33  }
  0xc8   : > { %v457_v48 = vpop.permute.xlu1 %456 }
  0xcc   : > { %v462_v49 = vpop.permute.xlu1 %461 }
 0x139   : > { %v467_v50 = vpop.permute.xlu1 %466 }
 0x13d   : > { %v472_v51 = vpop.permute.xlu1 %471 }
 0x141   : > { %v477_v59 = vpop.permute.xlu1 %476 }
 0x145   : > { %v482_v4 = vpop.permute.xlu1 %481 }
 0x196   : > { %v439_v35 = vpop.f32.mrb[0].mxu0 }
 0x197   : > { %v440_v36 = vadd.f32 %v439_v35, %v367_v34  ;;  %v1006_v37 = vpop.f32.mrb[1].mxu0 }
 0x199   : > { %v443_v38 = vmax.f32 %v440_v36, 0.0 }
 0x19b   : > { %1007 = vmatprep.subr.msk.mxu1 %vm509_vm4, %v443_v38 }
 0x19c   : > { %1008 = vmatpush3.msk.msra.mxu1 %vm509_vm4, %v443_v38 }
 0x19d   : > { %1010 = vmatmul.mubr.msk.f32.vlgmr.msra.gmra.mrb[0].mxu1 %vm484_vm3, %v268_v39 }
 0x19e   : > { %1012 = vmatprep.mubr.msk.f32.mxu1 %vm484_vm3, %v269_v40 }
 0x1a1   : > { %1013 = vmatmul.mubr.msk.f32.gmra.mrb[2].mxu1 %vm484_vm3, %v270_v41 }
 0x1a2   : > { %1015 = vmatprep.mubr.msk.f32.mxu1 %vm484_vm3, %v271_v42 }
 0x1a5   : > { %1016 = vmatmul.mubr.msk.f32.gmra.mrb[4].mxu1 %vm484_vm3, %v272_v43 }
 0x1a6   : > { %1018 = vmatprep.mubr.msk.f32.mxu1 %vm484_vm3, %v273_v44 }
 0x1a9   : > { %1019 = vmatmul.mubr.msk.f32.gmra.mrb[6].mxu1 %vm484_vm3, %v274_v45 }
 0x270   : > { %v1011_v52 = vpop.f32.mrb[0].mxu1 }
 0x271   : > { %v585_v53 = vadd.f32 %v1011_v52, %v452_v47  ;;  %v579_v54 = vpop.f32.mrb[1].mxu1 }
 0x272   : > { %v580_v55 = vadd.f32 %v579_v54, %v447_v46 }
 0x273   : > { %628 = vrot.lane.b32.xlu1 %v585_v53, %s1092_s18 }
 0x274   : > { %v1014_v56 = vpop.f32.mrb[2].mxu1  ;;  %626 = vrot.lane.b32.xlu0 %v580_v55, %s1092_s18 }
 0x275   : > { %v595_v57 = vadd.f32 %v1014_v56, %v462_v49  ;;  %v589_v58 = vpop.f32.mrb[3].mxu1 }
 0x276   : > { %v590_v60 = vadd.f32 %v589_v58, %v457_v48 }
 0x277   : > { %632 = vrot.lane.b32.xlu1 %v595_v57, %s1092_s18 }
 0x278   : > { %v1017_v61 = vpop.f32.mrb[4].mxu1  ;;  %630 = vrot.lane.b32.xlu0 %v590_v60, %s1092_s18 }
 0x279   : > { %v605_v62 = vadd.f32 %v1017_v61, %v472_v51  ;;  %v599_v63 = vpop.f32.mrb[5].mxu1 }
 0x27a   : > { %v600_v3 = vadd.f32 %v599_v63, %v467_v50 }
 0x27b   : > { %636 = vrot.lane.b32.xlu1 %v605_v62, %s1092_s18 }
 0x27c   : > { %v1020_v6 = vpop.f32.mrb[6].mxu1  ;;  %634 = vrot.lane.b32.xlu0 %v600_v3, %s1092_s18 }
 0x27d   : > { %v615_v7 = vadd.f32 %v1020_v6, %v482_v4  ;;  %v609_v12 = vpop.f32.mrb[7].mxu1 }
 0x27e   : > { %v610_v13 = vadd.f32 %v609_v12, %v477_v59 }
 0x27f   : > { %640 = vrot.lane.b32.xlu1 %v615_v7, %s1092_s18 }
 0x280   : > { %638 = vrot.lane.b32.xlu0 %v610_v13, %s1092_s18 }
 0x2e5   : > { %v629_v14 = vpop.permute.xlu1 %628 }
 0x2e6   : > { %v651_v15 = vadd.f32 %v629_v14, %v585_v53  ;;  %v627_v20 = vpop.permute.xlu0 %626 }
 0x2e7   : > { %v650_v21 = vadd.f32 %v627_v20, %v580_v55 }
 0x2e8   : > { %v957_v22 = vmul.f32 -1.442695, %v651_v15 }
 0x2e9   : > { %v956_v23 = vmul.f32 -1.442695, %v650_v21  ;;  %v633_v28 = vpop.permute.xlu1 %632 }
 0x2ea   : > { %1048 = vpow2.f32 %v957_v22  ;;  %v653_v29 = vadd.f32 %v633_v28, %v595_v57  ;;  %v631_v30 = vpop.permute.xlu0 %630 }
 0x2eb   : > { %1050 = vpow2.f32 %v956_v23  ;;  %v652_v31 = vadd.f32 %v631_v30, %v590_v60 }
 0x2ec   : > { %v959_v32 = vmul.f32 -1.442695, %v653_v29 }
 0x2ed   : > { %v958_v33 = vmul.f32 -1.442695, %v652_v31  ;;  %v637_v34 = vpop.permute.xlu1 %636 }
 0x2ee   : > { %1052 = vpow2.f32 %v959_v32  ;;  %v655_v35 = vadd.f32 %v637_v34, %v605_v62  ;;  %v635_v36 = vpop.permute.xlu0 %634 }
 0x2ef   : > { %1054 = vpow2.f32 %v958_v33  ;;  %v654_v37 = vadd.f32 %v635_v36, %v600_v3 }
 0x2f0   : > { %v961_v38 = vmul.f32 -1.442695, %v655_v35 }
 0x2f1   : > { %v960_v39 = vmul.f32 -1.442695, %v654_v37  ;;  %v641_v40 = vpop.permute.xlu1 %640 }
 0x2f2   : > { %1056 = vpow2.f32 %v961_v38  ;;  %v657_v41 = vadd.f32 %v641_v40, %v615_v7  ;;  %v639_v42 = vpop.permute.xlu0 %638 }
 0x2f3   : > { %1058 = vpow2.f32 %v960_v39  ;;  %v656_v43 = vadd.f32 %v639_v42, %v610_v13 }
 0x2f4   : > { %v1049_v44 = vpop.eup %1048  ;;  %v963_v45 = vmul.f32 -1.442695, %v657_v41 }
 0x2f5   : > { %v1051_v46 = vpop.eup %1050  ;;  %v683_v47 = vadd.f32 1.0, %v1049_v44  ;;  %v962_v48 = vmul.f32 -1.442695, %v656_v43 }
 0x2f6   : > { %v682_v49 = vadd.f32 1.0, %v1051_v46  ;;  %1060 = vpow2.f32 %v963_v45 }
 0x2f7   : > { %1062 = vrcp.f32 %v683_v47 }
 0x2f8   : > { %v1053_v50 = vpop.eup %1052  ;;  %1064 = vrcp.f32 %v682_v49 }
 0x2f9   : > { %v1055_v51 = vpop.eup %1054  ;;  %v685_v52 = vadd.f32 1.0, %v1053_v50  ;;  %1066 = vpow2.f32 %v962_v48 }
 0x2fa   : > { %v684_v53 = vadd.f32 1.0, %v1055_v51 }
 0x2fb   : > { %1068 = vrcp.f32 %v685_v52 }
 0x2fc   : > { %v1057_v54 = vpop.eup %1056  ;;  %1070 = vrcp.f32 %v684_v53 }
 0x2fd   : > { %v1059_v55 = vpop.eup %1058  ;;  %v687_v56 = vadd.f32 1.0, %v1057_v54 }
 0x2fe   : > { %v686_v57 = vadd.f32 1.0, %v1059_v55 }
 0x2ff   : > { %1072 = vrcp.f32 %v687_v56 }
 0x300   : > { %v1061_v58 = vpop.eup %1060  ;;  %1074 = vrcp.f32 %v686_v57 }
 0x301   : > { %v1063_v59 = vpop.eup %1062  ;;  %v689_v60 = vadd.f32 1.0, %v1061_v58 }
 0x302   : > { %v1065_v61 = vpop.eup %1064  ;;  %713 = vperm.xlu1 %1047, %v1063_v59  }
 0x303   : > { %v1067_v62 = vpop.eup %1066  ;;  %1076 = vrcp.f32 %v689_v60  ;;  %708 = vperm.xlu0 %1046, %v1065_v61  }
 0x304   : > { %v688_v63 = vadd.f32 1.0, %v1067_v62 }
 0x305   : > { %v1069_v3 = vpop.eup %1068 }
 0x306   : > { %v1071_v4 = vpop.eup %1070  ;;  %1078 = vrcp.f32 %v688_v63  ;;  %723 = vperm.xlu1 %1047, %v1069_v3  }
 0x307   : > { %718 = vperm.xlu0 %1046, %v1071_v4  }
 0x309   : > { %v1073_v6 = vpop.eup %1072 }
 0x30a   : > { %v1075_v7 = vpop.eup %1074  ;;  %733 = vperm.xlu1 %1047, %v1073_v6  }
 0x30b   : > { %728 = vperm.xlu0 %1046, %v1075_v7  }
 0x30d   : > { %v1077_v12 = vpop.eup %1076 }
 0x30e   : > { %743 = vperm.xlu1 %1047, %v1077_v12  }
 0x310   : > { %v1079_v13 = vpop.eup %1078 }
 0x311   : > { %738 = vperm.xlu0 %1046, %v1079_v13  }
 0x381   : > { %v714_v14 = vpop.permute.xlu1 %713 }
 0x382   : > { %v748_v15 = vmul.f32 %v714_v14, %v1153_v2  ;;  %v749_v20 = vmul.f32 %v714_v14, %v1160_v5  ;;  %v709_v21 = vpop.permute.xlu0 %708 }
 0x383   : > { %v746_v22 = vmul.f32 %v709_v21, %v1147_v0  ;;  %v747_v23 = vmul.f32 %v709_v21, %v1150_v1 }
 0x384   : > { %764 = vst [vmem:[%s1301_s24 + $0x10] sm:$0xff] %v748_v15  ;;  %765 = vst [vmem:[%s1301_s24 + $0x18] sm:$0xff] %v749_v20 }
 0x385   : > { %762 = vst [vmem:[%s1301_s24] sm:$0xff] %v746_v22  ;;  %763 = vst [vmem:[%s1301_s24 + $0x8] sm:$0xff] %v747_v23  ;;  %v724_v28 = vpop.permute.xlu1 %723  ;;  %v804_v5 = vadd.f32 %v748_v15, %v746_v22  ;;  %v817_v31 = vadd.f32 %v749_v20, %v747_v23 }
 0x386   : > { %v752_v29 = vmul.f32 %v724_v28, %v1167_v8  ;;  %v753_v2 = vmul.f32 %v724_v28, %v1170_v9  ;;  %v719_v30 = vpop.permute.xlu0 %718 }
 0x387   : > { %v750_v32 = vmul.f32 %v719_v30, %v1173_v10  ;;  %v751_v0 = vmul.f32 %v719_v30, %v1176_v11 }
 0x388   : > { %768 = vst [vmem:[%s1301_s24 + $0x30] sm:$0xff] %v752_v29  ;;  %769 = vst [vmem:[%s1301_s24 + $0x38] sm:$0xff] %v753_v2  ;;  %v779_v38 = vmax.f32 %v748_v15, %v752_v29  ;;  %v792_v39 = vmax.f32 %v749_v20, %v753_v2 }
 0x389   : > { %766 = vst [vmem:[%s1301_s24 + $0x20] sm:$0xff] %v750_v32  ;;  %767 = vst [vmem:[%s1301_s24 + $0x28] sm:$0xff] %v751_v0  ;;  %v805_v1 = vadd.f32 %v804_v5, %v750_v32  ;;  %v818_v33 = vadd.f32 %v817_v31, %v751_v0  ;;  %v734_v8 = vpop.permute.xlu1 %733  ;;  %v778_v42 = vmax.f32 %v746_v22, %v750_v32 }
 0x38a   : > { %v756_v9 = vmul.f32 %v734_v8, %v1187_v16  ;;  %v757_v34 = vmul.f32 %v734_v8, %v1190_v17  ;;  %v729_v35 = vpop.permute.xlu0 %728  ;;  %v791_v17 = vmax.f32 %v747_v23, %v751_v0 }
 0x38b   : > { %v806_v36 = vadd.f32 %v805_v1, %v752_v29  ;;  %v819_v10 = vadd.f32 %v818_v33, %v753_v2  ;;  %v754_v37 = vmul.f32 %v729_v35, %v1193_v18  ;;  %v755_v11 = vmul.f32 %v729_v35, %v1196_v19 }
 0x38c   : > { %772 = vst [vmem:[%s1301_s24 + $0x50] sm:$0xff] %v756_v9  ;;  %773 = vst [vmem:[%s1301_s24 + $0x58] sm:$0xff] %v757_v34  ;;  %v781_v19 = vmax.f32 %v779_v38, %v756_v9  ;;  %v794_v44 = vmax.f32 %v792_v39, %v757_v34 }
 0x38d   : > { %770 = vst [vmem:[%s1301_s24 + $0x40] sm:$0xff] %v754_v37  ;;  %771 = vst [vmem:[%s1301_s24 + $0x48] sm:$0xff] %v755_v11  ;;  %v807_v40 = vadd.f32 %v806_v36, %v754_v37  ;;  %v820_v41 = vadd.f32 %v819_v10, %v755_v11  ;;  %v744_v16 = vpop.permute.xlu1 %743  ;;  %v780_v47 = vmax.f32 %v778_v42, %v754_v37 }
 0x38e   : > { %v760_v43 = vmul.f32 %v744_v16, %v1207_v24  ;;  %v761_v18 = vmul.f32 %v744_v16, %v1210_v25  ;;  %v793_v48 = vmax.f32 %v791_v17, %v755_v11 }
 0x38f   : > { %v808_v45 = vadd.f32 %v807_v40, %v756_v9  ;;  %v821_v46 = vadd.f32 %v820_v41, %v757_v34 }
 0x390   : > { %776 = vst [vmem:[%s1301_s24 + $0x70] sm:$0xff] %v760_v43  ;;  %777 = vst [vmem:[%s1301_s24 + $0x78] sm:$0xff] %v761_v18  ;;  %v739_v49 = vpop.permute.xlu0 %738  ;;  %v783_v50 = vmax.f32 %v781_v19, %v760_v43  ;;  %v796_v51 = vmax.f32 %v794_v44, %v761_v18 }
 0x391   : > { %v758_v52 = vmul.f32 %v739_v49, %v1213_v26  ;;  %v759_v53 = vmul.f32 %v739_v49, %v1216_v27 }
 0x393   : > { %774 = vst [vmem:[%s1301_s24 + $0x60] sm:$0xff] %v758_v52  ;;  %775 = vst [vmem:[%s1301_s24 + $0x68] sm:$0xff] %v759_v53  ;;  %v782_v24 = vmax.f32 %v780_v47, %v758_v52  ;;  %v795_v54 = vmax.f32 %v793_v48, %v759_v53  ;;  %v809_v25 = vadd.f32 %v808_v45, %v758_v52 }
 0x394   : > { %v822_v55 = vadd.f32 %v821_v46, %v759_v53 }
 0x395   : > { %v784_v56 = vmax.f32 %v782_v24, %v783_v50  ;;  %v797_v57 = vmax.f32 %v795_v54, %v796_v51  ;;  %v810_v58 = vadd.f32 %v809_v25, %v760_v43 }
 0x396   : > { %v823_v59 = vadd.f32 %v822_v55, %v761_v18 }
 0x397   : > { %v785_v60 = vrot.slane %v784_v56, 4  ;;  %v798_v61 = vrot.slane %v797_v57, 4  ;;  %v811_v62 = vrot.slane %v810_v58, 4 }
 0x398   : > { %v824_v63 = vrot.slane %v823_v59, 4 }
 0x399   : > { %v786_v3 = vmax.f32 %v784_v56, %v785_v60  ;;  %v799_v4 = vmax.f32 %v797_v57, %v798_v61  ;;  %v812_v6 = vadd.f32 %v811_v62, %v810_v58 }
 0x39a   : > { %v825_v26 = vadd.f32 %v824_v63, %v823_v59 }
 0x39b   : > { %v787_v27 = vrot.slane %v786_v3, 2  ;;  %v800_v7 = vrot.slane %v799_v4, 2  ;;  %v813_v12 = vrot.slane %v812_v6, 2 }
 0x39c   : > { %v826_v13 = vrot.slane %v825_v26, 2 }
 0x39d   : > { %v788_v14 = vmax.f32 %v786_v3, %v787_v27  ;;  %v801_v15 = vmax.f32 %v799_v4, %v800_v7  ;;  %v814_v20 = vadd.f32 %v813_v12, %v812_v6 }
 0x39e   : > { %v827_v21 = vadd.f32 %v826_v13, %v825_v26 }
 0x39f   : > { %v789_v22 = vrot.slane %v788_v14, 1  ;;  %v802_v23 = vrot.slane %v801_v15, 1  ;;  %v815_v28 = vrot.slane %v814_v20, 1 }
 0x3a0   : > { %v828_v29 = vrot.slane %v827_v21, 1 }
 0x3a1   : > { %v816_v2 = vadd.f32 %v815_v28, %v814_v20  ;;  %v790_v5 = vmax.f32 %v788_v14, %v789_v22  ;;  %v803_v31 = vmax.f32 %v801_v15, %v802_v23 }
 0x3a2   : > { %v829_v30 = vadd.f32 %v828_v29, %v827_v21 }
 0x3a3   : > { %v830_v32 = vmul.f32 0.015625, %v816_v2 }
 0x3a4   : > { %v831_v0 = vmul.f32 0.015625, %v829_v30 }
 0x3a5   : > { %v833_v1 = vsel %vm832_vm5, %v790_v5, %v830_v32 }
 0x3a6   : > { %v834_v33 = vsel %vm832_vm5, %v803_v31, %v831_v0 }
 0x3a7   : > { %v837_v8 = vcombine.low %v833_v1, %v834_v33 }
 0x3a9   : > { %964 = vst.sshfl [vmem:[%s264_s27] sm:$0x33 pattern:$0x76325410] %v837_v8 }
 0x3aa PF: > { %s17_s21 = sadd.s32 1, %s1086_s21  }
 0x3ab   : > { %p14_p4 = scmp.ge.s32.totalorder %s17_s21, 4  }
 0x3ad   :  { %16 = sbr.rel (!%p14_p4) target bundleno = 1 (0x1), region = 82 }

// kernel: bottleneck_forward.11
= control target key start
LH: loop header
LB: loop body
LE: loop exit
PB: predicated region body
PF: predicated region fallthrough
CT: control target
= control target key end

     0   :  { %s459_s12 = smov 0   ;;  %s561_s0 = inlined_call_operand.vmem [shape: f32[2,64,256], index: 0, kind: input, shape index: {}]   ;;  %s562_s1 = inlined_call_operand.vmem [shape: f32[2,1,256], index: 1, kind: input, shape index: {}]   ;;  %s563_s2 = inlined_call_operand.vmem [shape: f32[2,64,256], index: 2, kind: input, shape index: {}]   ;;  %s564_s3 = inlined_call_operand.vmem [shape: f32[2,64,256], index: 3, kind: output, shape index: {}]  }
   0x1 LB: > { %s401_s13 = sadd.s32 4294967295, %s437_s12   ;;  %p405_p0 = scmp.ge.s32.totalorder %s437_s12, 1  ;;  %s437_s12 = sphi %s459_s12, %s13_s12  }
   0x2   : > { %p156_p1 = scmp.lt.s32.totalorder %s437_s12, 3 }
   0x4   : > { %p157_p2 = pnand %p405_p0, %p156_p1 }
   0x5   : > { %p189_p3 = scmp.lt.s32.totalorder (!%p157_p2), %s401_s13, 1  ;;  %v232_v4 = vlaneseq (!%p157_p2) }
   0x6   : > { %160 = sbr.rel (%p157_p2) target bundleno = 62 (0x3e), region = 32 }
   0x7   : > { %v233_v5 = vshrl.u32 (!%p157_p2), %v232_v4, 7 }
   0x9   : > { %v234_v6 = vsub.s32 (!%p157_p2), 0, %v233_v5  ;;  %v238_v7 = vsub.s32 (!%p157_p2), 1, %v233_v5 }
   0xd   : > { %s566_s13 = smov (!%p189_p3, %s401_s13), 1 }
   0xe   : > { %s408_s14 = sshll.u32 %s566_s13, 1  ;;  %s470_s18 = sshll.u32 %s566_s13, 7 }
   0xf   : > { %s197_s17 = scalar_lea.vmem %s562_s1, %s408_s14  ;;  %s476_s21 = scalar_lea.vmem %s561_s0, %s470_s18 }
  0x10   : > { %v208_v0 = vld [vmem:[%s197_s17] sm:$0x3]  ;;  %s482_s24 = scalar_lea.vmem %s563_s2, %s470_s18  ;;  %v216_v9 = vld [vmem:[%s476_s21 + $0x8] sm:$0xff]  ;;  %v217_v13 = vld [vmem:[%s476_s21 + $0x10] sm:$0xff]  ;;  %s519_s27 = scalar_lea.vmem %s564_s3, %s470_s18 }
  0x11   : > { %v413_v1 = vmul.f32 -1.442695, %v208_v0  ;;  %v215_v8 = vld [vmem:[%s476_s21] sm:$0xff]  ;;  %v259_v12 = vld [vmem:[%s482_s24 + $0x8] sm:$0xff]  ;;  %v218_v14 = vld [vmem:[%s476_s21 + $0x18] sm:$0xff] }
  0x12   : > { %v258_v11 = vld [vmem:[%s482_s24] sm:$0xff]  ;;  %v220_v18 = vld [vmem:[%s476_s21 + $0x28] sm:$0xff]  ;;  %v221_v19 = vld [vmem:[%s476_s21 + $0x30] sm:$0xff] }
  0x13   : > { %427 = vpow2.f32 %v413_v1  ;;  %v219_v15 = vld [vmem:[%s476_s21 + $0x20] sm:$0xff]  ;;  %v222_v20 = vld [vmem:[%s476_s21 + $0x38] sm:$0xff]  ;;  %v260_v21 = vld [vmem:[%s482_s24 + $0x10] sm:$0xff] }
  0x14   : > { %v261_v22 = vld [vmem:[%s482_s24 + $0x18] sm:$0xff]  ;;  %v262_v23 = vld [vmem:[%s482_s24 + $0x20] sm:$0xff]  ;;  %v263_v28 = vld [vmem:[%s482_s24 + $0x28] sm:$0xff] }
  0x15   : > { %v264_v29 = vld [vmem:[%s482_s24 + $0x30] sm:$0xff]  ;;  %v265_v30 = vld [vmem:[%s482_s24 + $0x38] sm:$0xff]  ;;  %v223_v39 = vld [vmem:[%s476_s21 + $0x40] sm:$0xff] }
  0x16   : > { %v224_v40 = vld [vmem:[%s476_s21 + $0x48] sm:$0xff]  ;;  %v225_v41 = vld [vmem:[%s476_s21 + $0x50] sm:$0xff]  ;;  %v266_v46 = vld [vmem:[%s482_s24 + $0x40] sm:$0xff] }
  0x17   : > { %v267_v47 = vld [vmem:[%s482_s24 + $0x48] sm:$0xff]  ;;  %v268_v48 = vld [vmem:[%s482_s24 + $0x50] sm:$0xff]  ;;  %v226_v49 = vld [vmem:[%s476_s21 + $0x58] sm:$0xff] }
  0x18   : > { %v227_v50 = vld [vmem:[%s476_s21 + $0x60] sm:$0xff]  ;;  %v228_v51 = vld [vmem:[%s476_s21 + $0x68] sm:$0xff]  ;;  %v229_v56 = vld [vmem:[%s476_s21 + $0x70] sm:$0xff] }
  0x19   : > { %v230_v57 = vld [vmem:[%s476_s21 + $0x78] sm:$0xff]  ;;  %v270_v63 = vld [vmem:[%s482_s24 + $0x60] sm:$0xff]  ;;  %v271_v4 = vld [vmem:[%s482_s24 + $0x68] sm:$0xff] }
  0x1a   : > { %v269_v62 = vld [vmem:[%s482_s24 + $0x58] sm:$0xff]  ;;  %v272_v5 = vld [vmem:[%s482_s24 + $0x70] sm:$0xff] }
  0x1d   : > { %v428_v2 = vpop.eup %427 }
  0x1e   : > { %v212_v3 = vadd.f32 1.0, %v428_v2 }
  0x20   : > { %429 = vrcp.f32 %v212_v3 }
  0x2a   : > { %v430_v10 = vpop.eup %429 }
  0x2b   : > { %v491_v16 = vrot.slane %v430_v10, %v234_v6  ;;  %v493_v17 = vrot.slane %v430_v10, %v238_v7  ;;  %v273_v6 = vld [vmem:[%s482_s24 + $0x78] sm:$0xff] }
  0x2d   : > { %v242_v24 = vmul.f32 %v491_v16, %v215_v8  ;;  %v243_v25 = vmul.f32 %v493_v17, %v216_v9  ;;  %v244_v26 = vmul.f32 %v491_v16, %v217_v13  ;;  %v245_v27 = vmul.f32 %v493_v17, %v218_v14 }
  0x2e   : > { %v246_v31 = vmul.f32 %v491_v16, %v219_v15  ;;  %v247_v32 = vmul.f32 %v493_v17, %v220_v18  ;;  %v248_v33 = vmul.f32 %v491_v16, %v221_v19  ;;  %v249_v34 = vmul.f32 %v493_v17, %v222_v20 }
  0x2f   : > { %v274_v35 = vadd.f32 %v258_v11, %v242_v24  ;;  %v275_v36 = vadd.f32 %v259_v12, %v243_v25  ;;  %v276_v37 = vadd.f32 %v260_v21, %v244_v26  ;;  %v277_v38 = vadd.f32 %v261_v22, %v245_v27 }
  0x30   : > { %v278_v42 = vadd.f32 %v262_v23, %v246_v31  ;;  %v279_v43 = vadd.f32 %v263_v28, %v247_v32  ;;  %v280_v44 = vadd.f32 %v264_v29, %v248_v33  ;;  %v281_v45 = vadd.f32 %v265_v30, %v249_v34 }
  0x31   : > { %v290_v52 = vmax.f32 %v274_v35, 0.0  ;;  %v291_v53 = vmax.f32 %v275_v36, 0.0  ;;  %v292_v54 = vmax.f32 %v276_v37, 0.0  ;;  %v293_v55 = vmax.f32 %v277_v38, 0.0 }
  0x32   : > { %v294_v58 = vmax.f32 %v278_v42, 0.0  ;;  %v295_v59 = vmax.f32 %v279_v43, 0.0  ;;  %v296_v60 = vmax.f32 %v280_v44, 0.0  ;;  %v297_v61 = vmax.f32 %v281_v45, 0.0 }
  0x33   : > { %306 = vst [vmem:[%s519_s27] sm:$0xff] %v290_v52  ;;  %307 = vst [vmem:[%s519_s27 + $0x8] sm:$0xff] %v291_v53  ;;  %v250_v0 = vmul.f32 %v491_v16, %v223_v39  ;;  %v251_v1 = vmul.f32 %v493_v17, %v224_v40  ;;  %v252_v2 = vmul.f32 %v491_v16, %v225_v41 }
  0x34   : > { %308 = vst [vmem:[%s519_s27 + $0x10] sm:$0xff] %v292_v54  ;;  %309 = vst [vmem:[%s519_s27 + $0x18] sm:$0xff] %v293_v55  ;;  %v253_v3 = vmul.f32 %v493_v17, %v226_v49  ;;  %v254_v7 = vmul.f32 %v491_v16, %v227_v50  ;;  %v255_v8 = vmul.f32 %v493_v17, %v228_v51 }
  0x35   : > { %310 = vst [vmem:[%s519_s27 + $0x20] sm:$0xff] %v294_v58  ;;  %311 = vst [vmem:[%s519_s27 + $0x28] sm:$0xff] %v295_v59  ;;  %v256_v9 = vmul.f32 %v491_v16, %v229_v56  ;;  %v257_v10 = vmul.f32 %v493_v17, %v230_v57  ;;  %v282_v11 = vadd.f32 %v266_v46, %v250_v0 }
  0x36   : > { %312 = vst [vmem:[%s519_s27 + $0x30] sm:$0xff] %v296_v60  ;;  %313 = vst [vmem:[%s519_s27 + $0x38] sm:$0xff] %v297_v61  ;;  %v283_v12 = vadd.f32 %v267_v47, %v251_v1  ;;  %v284_v13 = vadd.f32 %v268_v48, %v252_v2  ;;  %v285_v14 = vadd.f32 %v269_v62, %v253_v3 }
  0x37   : > { %v286_v15 = vadd.f32 %v270_v63, %v254_v7  ;;  %v287_v18 = vadd.f32 %v271_v4, %v255_v8  ;;  %v288_v19 = vadd.f32 %v272_v5, %v256_v9  ;;  %v289_v20 = vadd.f32 %v273_v6, %v257_v10 }
  0x38   : > { %v298_v21 = vmax.f32 %v282_v11, 0.0  ;;  %v299_v16 = vmax.f32 %v283_v12, 0.0  ;;  %v300_v22 = vmax.f32 %v284_v13, 0.0  ;;  %v301_v17 = vmax.f32 %v285_v14, 0.0 }
  0x39   : > { %v302_v23 = vmax.f32 %v286_v15, 0.0  ;;  %v303_v24 = vmax.f32 %v287_v18, 0.0  ;;  %v304_v25 = vmax.f32 %v288_v19, 0.0  ;;  %v305_v26 = vmax.f32 %v289_v20, 0.0 }
  0x3a   : > { %314 = vst [vmem:[%s519_s27 + $0x40] sm:$0xff] %v298_v21  ;;  %315 = vst [vmem:[%s519_s27 + $0x48] sm:$0xff] %v299_v16 }
  0x3b   : > { %316 = vst [vmem:[%s519_s27 + $0x50] sm:$0xff] %v300_v22  ;;  %317 = vst [vmem:[%s519_s27 + $0x58] sm:$0xff] %v301_v17 }
  0x3c   : > { %318 = vst [vmem:[%s519_s27 + $0x60] sm:$0xff] %v302_v23  ;;  %319 = vst [vmem:[%s519_s27 + $0x68] sm:$0xff] %v303_v24 }
  0x3d   : > { %320 = vst [vmem:[%s519_s27 + $0x70] sm:$0xff] %v304_v25  ;;  %321 = vst [vmem:[%s519_s27 + $0x78] sm:$0xff] %v305_v26 }
  0x3e PF: > { %s13_s12 = sadd.s32 1, %s437_s12  }
  0x3f   : > { %p10_p4 = scmp.ge.s32.totalorder %s13_s12, 4  }
  0x41   :  { %12 = sbr.rel (!%p10_p4) target bundleno = 1 (0x1), region = 68 }

// kernel: bottleneck_forward.10
= control target key start
LH: loop header
LB: loop body
LE: loop exit
PB: predicated region body
PF: predicated region fallthrough
CT: control target
= control target key end

     0   :  { %s500_s19 = smov 0   ;;  %s552_s0 = inlined_call_operand.vmem [shape: f32[2,98,256], index: 0, kind: input, shape index: {}]   ;;  %s553_s1 = inlined_call_operand.vmem [shape: f32[1,98], index: 1, kind: input, shape index: {}]   ;;  %s554_s2 = inlined_call_operand.<no memory space> [shape: f32[1,1], index: 2, kind: input, shape index: {}]   ;;  %s555_s4 = inlined_call_operand.vmem [shape: f32[2,1,256], index: 4, kind: output, shape index: {}]   ;;  %s556_s3 = inlined_call_operand.<no memory space> [shape: f32[1,1], index: 3, kind: input, shape index: {}]  }
   0x1   :  { %v9_v0 = vstv %s554_s2  ;;  %v11_v1 = vstv %s556_s3 }
   0x2   :  { %10 = vst [vmem:[#allocation2] sm:$0x1] %v9_v0  ;;  %12 = vst [vmem:[#allocation3] sm:$0x1] %v11_v1 }
   0x3 LB: > { %s409_s20 = sadd.s32 4294967295, %s464_s19   ;;  %p413_p0 = scmp.ge.s32.totalorder %s464_s19, 1  ;;  %s464_s19 = sphi %s500_s19, %s18_s19  }
   0x4   : > { %p166_p1 = scmp.lt.s32.totalorder %s464_s19, 3 }
   0x6   : > { %p167_p2 = pnand %p413_p0, %p166_p1 }
   0x7   : > { %p191_p3 = scmp.lt.s32.totalorder (!%p167_p2), %s409_s20, 1  ;;  %v466_v2 = vmov (!%p167_p2), 0.0   ;;  %v467_v4 = vmov (!%p167_p2), 0   ;;  %vm233_vm0 = vcmask (!%p167_p2), 1041408   ;;  %v200_v44 = vld [vmem:[%s553_s1] sm:$0x1] (!%p167_p2)  ;;  %v316_v45 = vlaneseq (!%p167_p2) }
   0x8   : > { %170 = sbr.rel (%p167_p2) target bundleno = 272 (0x110), region = 36  ;;  %304 = vmatprep.mubr.f32.mxu0 (!%p167_p2), %v466_v2  ;;  %457 = vset.pattern.permute.xlu0 (!%p167_p2), %v467_v4  ;;  %vm229_vm1 = vcmask (!%p167_p2), 801792   ;;  %v468_v49 = vmov (!%p167_p2), 1966171168  }
   0x9   : > { %v201_v3 = vld [vmem:[#allocation2] sm:$0x1] (!%p167_p2)  ;;  %v202_v5 = vld [vmem:[#allocation3] sm:$0x1] (!%p167_p2)  ;;  %v317_v46 = vshrl.u32 (!%p167_p2), %v316_v45, 7  ;;  %v337_v50 = vunpack.c.l.s4 (!%p167_p2), %v468_v49  ;;  %vm353_vm2 = vcmp.lt.s32.totalorder (!%p167_p2), %v316_v45, 256 }
   0xa   : > { %313 = vperm.xlu0 (!%p167_p2), %457, %v201_v3  }
   0xb   : > { %v318_v48 = vsub.s32 (!%p167_p2), 0, %v317_v46  ;;  %v338_v53 = vunpack.c.0.s8 (!%p167_p2), %v337_v50 }
   0xd   : > { %v341_v60 = vsub.s32 (!%p167_p2), %v338_v53, %v317_v46 }
   0xe   : > { %324 = vperm.xlu0 (!%p167_p2), %457, %v202_v5  }
   0xf   : > { %s558_s20 = smov (!%p191_p3, %s409_s20), 1 }
  0x10   : > { %s445_s2 = smul.u32 208, %s558_s20  ;;  %s415_s25 = sshll.u32 %s558_s20, 1 }
  0x11   : > { %s199_s28 = scalar_lea.vmem %s555_s4, %s415_s25 }
  0x12   : > { %s514_s22 = scalar_lea.vmem %s552_s0, %s445_s2 }
  0x13   : > { %v204_v6 = vld [vmem:[%s514_s22 + $0x8] sm:$0xff]  ;;  %v206_v7 = vld [vmem:[%s514_s22 + $0x18] sm:$0xff]  ;;  %v203_v8 = vld [vmem:[%s514_s22] sm:$0xff] }
  0x14   : > { %v421_v9 = vpack.c.bf16 %v206_v7, %v204_v6  ;;  %v205_v10 = vld [vmem:[%s514_s22 + $0x10] sm:$0xff]  ;;  %v208_v11 = vld [vmem:[%s514_s22 + $0x28] sm:$0xff]  ;;  %v210_v12 = vld [vmem:[%s514_s22 + $0x38] sm:$0xff] }
  0x15   : > { %v423_v13 = vpack.c.bf16 %v205_v10, %v203_v8  ;;  %v425_v14 = vpack.c.bf16 %v210_v12, %v208_v11  ;;  %v207_v15 = vld [vmem:[%s514_s22 + $0x20] sm:$0xff]  ;;  %v209_v16 = vld [vmem:[%s514_s22 + $0x30] sm:$0xff]  ;;  %v212_v17 = vld [vmem:[%s514_s22 + $0x48] sm:$0xff] }
  0x16   : > { %422 = vmatprep.subr.bf16.mxu0 %v421_v9  ;;  %v214_v18 = vld [vmem:[%s514_s22 + $0x58] sm:$0xff]  ;;  %v427_v19 = vpack.c.bf16 %v209_v16, %v207_v15  ;;  %v211_v21 = vld [vmem:[%s514_s22 + $0x40] sm:$0xff]  ;;  %v213_v22 = vld [vmem:[%s514_s22 + $0x50] sm:$0xff] }
  0x17   : > { %424 = vmatpush1.bf16.msra.mxu0 %v423_v13  ;;  %v429_v20 = vpack.c.bf16 %v214_v18, %v212_v17  ;;  %v216_v23 = vld [vmem:[%s514_s22 + $0x68] sm:$0xff]  ;;  %v218_v24 = vld [vmem:[%s514_s22 + $0x78] sm:$0xff]  ;;  %v431_v25 = vpack.c.bf16 %v213_v22, %v211_v21  ;;  %v215_v27 = vld [vmem:[%s514_s22 + $0x60] sm:$0xff] }
  0x18   : > { %426 = vmatprep.subr.bf16.mxu0 %v425_v14  ;;  %v433_v26 = vpack.c.bf16 %v218_v24, %v216_v23  ;;  %v217_v28 = vld [vmem:[%s514_s22 + $0x70] sm:$0xff]  ;;  %v220_v29 = vld [vmem:[%s514_s22 + $0x88] sm:$0xff]  ;;  %v222_v30 = vld [vmem:[%s514_s22 + $0x98] sm:$0xff] }
  0x19   : > { %v435_v31 = vpack.c.bf16 %v217_v28, %v215_v27  ;;  %v437_v32 = vpack.c.bf16 %v222_v30, %v220_v29  ;;  %v219_v33 = vld [vmem:[%s514_s22 + $0x80] sm:$0xff]  ;;  %v221_v34 = vld [vmem:[%s514_s22 + $0x90] sm:$0xff]  ;;  %v224_v35 = vld [vmem:[%s514_s22 + $0xa8] sm:$0xff] }
  0x1a   : > { %v226_v36 = vld [vmem:[%s514_s22 + $0xb8] sm:$0xff]  ;;  %v439_v37 = vpack.c.bf16 %v221_v34, %v219_v33  ;;  %v223_v39 = vld [vmem:[%s514_s22 + $0xa0] sm:$0xff]  ;;  %v225_v40 = vld [vmem:[%s514_s22 + $0xb0] sm:$0xff] }
  0x1b   : > { %428 = vmatpush1.bf16.msra.mxu0 %v427_v19  ;;  %v441_v38 = vpack.c.bf16 %v226_v36, %v224_v35  ;;  %v443_v41 = vpack.c.bf16 %v225_v40, %v223_v39  ;;  %v228_v42 = vld [vmem:[%s514_s22 + $0xc8] sm:$0x3]  ;;  %v227_v43 = vld [vmem:[%s514_s22 + $0xc0] sm:$0x3] }
  0x1c   : > { %430 = vmatprep.subr.bf16.mxu0 %v429_v20 }
  0x1f   : > { %432 = vmatpush1.bf16.msra.mxu0 %v431_v25 }
  0x20   : > { %434 = vmatprep.subr.bf16.mxu0 %v433_v26 }
  0x23   : > { %436 = vmatpush1.bf16.msra.mxu0 %v435_v31 }
  0x24   : > { %438 = vmatprep.subr.bf16.mxu0 %v437_v32 }
  0x27   : > { %440 = vmatpush1.bf16.msra.mxu0 %v439_v37 }
  0x28   : > { %442 = vmatprep.subr.bf16.mxu0 %v441_v38 }
  0x2b   : > { %444 = vmatpush1.bf16.msra.mxu0 %v443_v41 }
  0x2c   : > { %416 = vmatprep.subr.msk.mxu0 %vm233_vm0, %v228_v42 }
  0x2f   : > { %417 = vmatpush1.msk.msra.mxu0 %vm233_vm0, %v227_v43 }
  0x30   : > { %418 = vmatmul.mubr.msk.f32.vlgmr.msra.gmra.mrb[0].mxu0 %vm229_vm1, %v200_v44 }
  0x89   : > { %v314_v47 = vpop.permute.xlu0 %313 }
  0x8a   : > { %v319_v51 = vrot.slane %v314_v47, %v318_v48 }
  0x8d   : > { %v325_v52 = vpop.permute.xlu0 %324 }
  0x8e   : > { %v330_v55 = vrot.slane %v325_v52, %v318_v48 }
 0x103   : > { %v306_v54 = vpop.f32.mrb[0].mxu0 }
 0x104   : > { %v320_v56 = vmul.f32 %v319_v51, %v306_v54  ;;  %v308_v57 = vpop.f32.mrb[1].mxu0 }
 0x105   : > { %v321_v58 = vmul.f32 %v319_v51, %v308_v57 }
 0x106   : > { %v331_v59 = vadd.f32 %v330_v55, %v320_v56 }
 0x107   : > { %v332_v61 = vadd.f32 %v330_v55, %v321_v58 }
 0x109   : > { %v335_v62 = vcombine.low %v331_v59, %v332_v61 }
 0x10b   : > { %v342_v63 = vrot.slane %v335_v62, %v341_v60 }
 0x10d   : > { %v349_v0 = vrot.slane %v342_v63, %v341_v60 }
 0x10f   : > { %355 = vst.msk [vmem:[%s199_s28] sm:$0x3] %vm353_vm2, %v349_v0 }
 0x110 PF: > { %s18_s19 = sadd.s32 1, %s464_s19  }
 0x111   : > { %p15_p4 = scmp.ge.s32.totalorder %s18_s19, 4  }
 0x113   :  { %17 = sbr.rel (!%p15_p4) target bundleno = 3 (0x3), region = 66 }

</bundles_post_ra>
